<compile_context>
chip_gen: v6e
topology: v6e:2x2x1
jax: 0.10.0
libtpu: 0.0.40
codegen_flags: <defaults>
</compile_context>

<pallas_src>
import functools

import jax
import jax.numpy as jnp
from jax import lax
from jax.experimental import pallas as pl
from jax.experimental.pallas import tpu as pltpu


def _make_transform_block_kernel(H, W, C, L, compute_dtype):
    """L = batch_block * H * W (lane width of one grid-step slab)."""

    def kernel(x_ref, mask_ref, w3_ref, b3_ref, wa_ref, ba_ref, out_ref):
        # x_ref:    (C, L)        f32 input slab (channels on sublanes, batch*spatial on lanes)
        # mask_ref: (9, L)        compute_dtype tap-validity masks (1.0 valid / 0.0 padded)
        # w3_ref:   (3, 9, C, C)  compute_dtype per-stage, per-tap 3x3 weights, entry [o, i]
        # b3_ref:   (3, C, 1)     f32 biases
        # wa_ref:   (2, C, C)     compute_dtype 1x1 aggregate weights for [z, x]
        # ba_ref:   (C, 1)        f32 bias
        # out_ref:  (C, L)        f32

        # Hoist the broadcast tap masks once; reused by all three conv stages.
        mask_all = mask_ref[...]                                   # (9, L)
        masks = []
        for k in range(9):
            if k == 4:                       # center tap never leaves the image
                masks.append(None)
            else:
                masks.append(jnp.broadcast_to(mask_all[k:k + 1, :], (C, L)))

        shifts = []
        for ky in range(3):
            for kx in range(3):
                d = (ky - 1) * W + (kx - 1)
                shifts.append((-d) % L)

        def conv3x3_relu(src_c, stage):
            # src_c: (C, L) compute_dtype -> (C, L) f32 after bias + ReLU.
            acc = None
            for k in range(9):
                t = src_c if shifts[k] == 0 else pltpu.roll(src_c, shift=shifts[k], axis=1)
                if masks[k] is not None:
                    t = t * masks[k]         # zero-padding semantics (per-image)
                p = jnp.dot(w3_ref[stage, k], t, preferred_element_type=jnp.float32)
                acc = p if acc is None else acc + p
            return jnp.maximum(acc + b3_ref[stage], 0.0)

        x_c = x_ref[...].astype(compute_dtype)                     # cast input once
        h = conv3x3_relu(x_c, 0)
        h = conv3x3_relu(h.astype(compute_dtype), 1)
        z = conv3x3_relu(h.astype(compute_dtype), 2)
        # Dropout2d(p): identity at inference time (eval mode).
        out = (jnp.dot(wa_ref[0], z.astype(compute_dtype), preferred_element_type=jnp.float32)
               + jnp.dot(wa_ref[1], x_c, preferred_element_type=jnp.float32))
        out_ref[...] = (out + ba_ref[...]).astype(jnp.float32)

    return kernel


def transform_block(x_nchw, params, *, compute_dtype=jnp.float32, batch_block=1):
    """x_nchw: (N, C, H, W) float32. params: PyTorch-layout weights (see init_params)."""
    N, C, H, W = x_nchw.shape
    HW = H * W
    nb = batch_block
    assert N % nb == 0, "batch_block must divide N"
    G = N // nb
    L = nb * HW
    assert L % 128 == 0, "batch_block*H*W should be a multiple of 128 (lane-dense layout)"

    w1, b1, w2, b2, w3, b3, wa, ba = params

    def taps(w):   # OIHW (C, C, 3, 3) -> (9, C, C), tap k = ky*3 + kx, entry [o, i]
        return jnp.transpose(w, (2, 3, 0, 1)).reshape(9, C, C)

    w3x3 = jnp.stack([taps(w1), taps(w2), taps(w3)]).astype(compute_dtype)     # (3, 9, C, C)
    b3x3 = jnp.stack([b1.reshape(C, 1), b2.reshape(C, 1), b3.reshape(C, 1)])   # (3, C, 1)
    wa2 = wa.reshape(C, 2 * C)
    wagg = jnp.stack([wa2[:, :C], wa2[:, C:]]).astype(compute_dtype)           # (2, C, C)
    bagg = ba.reshape(C, 1)                                                    # (C, 1)

    # Per-image tap-validity masks, replicated across the nb images folded onto lanes.
    pos = jnp.arange(L, dtype=jnp.int32)
    col = pos % W
    row = (pos // W) % H                 # row *within each image* -> no cross-image leakage
    mask_rows = []
    for ky in range(3):
        for kx in range(3):
            dy, dx = ky - 1, kx - 1
            valid = ((row + dy >= 0) & (row + dy < H) & (col + dx >= 0) & (col + dx < W))
            mask_rows.append(valid)
    mask = jnp.stack(mask_rows).astype(compute_dtype)                          # (9, L)

    # (N, C, H, W) -> (G, C, nb*HW): channels on sublanes, batch folded into lanes.
    xk = x_nchw.reshape(G, nb, C, HW).transpose(0, 2, 1, 3).reshape(G, C, L)

    def const(shape):
        return pl.BlockSpec(shape, lambda n, _s=len(shape): (0,) * _s)

    grid_spec = pltpu.PrefetchScalarGridSpec(
        num_scalar_prefetch=0,
        grid=(G,),
        in_specs=[
            pl.BlockSpec((None, C, L), lambda n: (n, 0, 0)),   # x slab
            const((9, L)),                                     # tap masks
            const((3, 9, C, C)), const((3, C, 1)),             # 3x3 weights / biases
            const((2, C, C)), const((C, 1)),                   # 1x1 aggregate
        ],
        out_specs=pl.BlockSpec((None, C, L), lambda n: (n, 0, 0)),
    )

    out = pl.pallas_call(
        _make_transform_block_kernel(H, W, C, L, compute_dtype),
        out_shape=jax.ShapeDtypeStruct((G, C, L), jnp.float32),
        grid_spec=grid_spec,
        compiler_params=pltpu.CompilerParams(
            dimension_semantics=("parallel",),
            vmem_limit_bytes=32 * 1024 * 1024),
    )(xk, mask, w3x3, b3x3, wagg, bagg)

    return out.reshape(G, C, nb, HW).transpose(0, 2, 1, 3).reshape(N, C, H, W)


def reference(x, params, compute_dtype=jnp.float32):
    """Pure-JAX reference with the same compute-dtype casting as the kernel."""
    w1, b1, w2, b2, w3, b3, wa, ba = params
    dn = ('NCHW', 'OIHW', 'NCHW')

    def conv(h, w):
        return lax.conv_general_dilated(
            h.astype(compute_dtype), w.astype(compute_dtype), (1, 1), 'SAME',
            dimension_numbers=dn, preferred_element_type=jnp.float32)

    def c3r(h, w, b):
        return jnp.maximum(conv(h, w) + b.reshape(1, -1, 1, 1), 0.0)

    z = c3r(c3r(c3r(x, w1, b1), w2, b2), w3, b3)
    cat = jnp.concatenate([z, x], axis=1)
    return conv(cat, wa) + ba.reshape(1, -1, 1, 1)


def init_params(key, dim):
    """Deterministic synthetic parameters in PyTorch layouts:
    conv3x3 weights OIHW (dim, dim, 3, 3); biases (dim,); aggregate (dim, 2*dim, 1, 1)."""
    ks = jax.random.split(key, 8)
    s3 = 1.0 / jnp.sqrt(9.0 * dim)
    s1 = 1.0 / jnp.sqrt(2.0 * dim)
    w1 = jax.random.normal(ks[0], (dim, dim, 3, 3), jnp.float32) * s3
    b1 = jax.random.normal(ks[1], (dim,), jnp.float32) * 0.1
    w2 = jax.random.normal(ks[2], (dim, dim, 3, 3), jnp.float32) * s3
    b2 = jax.random.normal(ks[3], (dim,), jnp.float32) * 0.1
    w3 = jax.random.normal(ks[4], (dim, dim, 3, 3), jnp.float32) * s3
    b3 = jax.random.normal(ks[5], (dim,), jnp.float32) * 0.1
    wa = jax.random.normal(ks[6], (dim, 2 * dim, 1, 1), jnp.float32) * s1
    ba = jax.random.normal(ks[7], (dim,), jnp.float32) * 0.1
    return (w1, b1, w2, b2, w3, b3, wa, ba)


if __name__ == "__main__":
    key = jax.random.PRNGKey(0)
    k_x, k_x2, k_p = jax.random.split(key, 3)

    N, dim, H, W = 2, 4, 16, 16
    x = jax.random.normal(k_x, (N, dim, H, W), jnp.float32)      # NCHW, like PyTorch
    params = init_params(k_p, dim)

    # 1) Small-shape check (grid of 2 steps -> both v7x TensorCores busy), f32 compute.
    fwd_f32 = jax.jit(functools.partial(transform_block,
                                        compute_dtype=jnp.float32, batch_block=1))
    out_f32 = jax.block_until_ready(fwd_f32(x, params))
    ref_f32 = jax.block_until_ready(reference(x, params, jnp.float32))
    assert out_f32.shape == (N, dim, H, W)
    assert jnp.allclose(out_f32, ref_f32, atol=1e-4, rtol=1e-4), "f32 mismatch vs reference"

    # 2) Batch-folded-into-lanes path (batch_block > 1): checks the per-image masks keep
    #    rolls from leaking pixels across image boundaries inside the (C, nb*HW) slab.
    N2 = 8
    x2 = jax.random.normal(k_x2, (N2, dim, H, W), jnp.float32)
    fwd_nb4 = jax.jit(functools.partial(transform_block,
                                        compute_dtype=jnp.float32, batch_block=4))
    out_nb4 = jax.block_until_ready(fwd_nb4(x2, params))
    ref_nb4 = jax.block_until_ready(reference(x2, params, jnp.float32))
    assert jnp.allclose(out_nb4, ref_nb4, atol=1e-4, rtol=1e-4), "batch-folded mismatch"

    # 3) Optional bf16 MXU-operand configuration (v6e/v7x), f32 accumulation.
    fwd_bf16 = jax.jit(functools.partial(transform_block,
                                         compute_dtype=jnp.bfloat16, batch_block=1))
    out_bf16 = jax.block_until_ready(fwd_bf16(x, params))
    ref_bf16 = jax.block_until_ready(reference(x, params, jnp.bfloat16))
    assert jnp.allclose(out_bf16, ref_bf16, atol=2e-2, rtol=2e-2), "bf16 mismatch vs reference"

    print("KERNEL_OK")
</pallas_src>

<mosaic_0001>
module attributes {stable_mosaic.version = 11 : i64} {
  func.func @kernel(%arg0: i32, %arg1: memref<1x4x256xf32, #tpu.memory_space<vmem>>, %arg2: memref<9x256xf32, #tpu.memory_space<vmem>>, %arg3: memref<3x9x4x4xf32, #tpu.memory_space<vmem>>, %arg4: memref<3x4x1xf32, #tpu.memory_space<vmem>>, %arg5: memref<2x4x4xf32, #tpu.memory_space<vmem>>, %arg6: memref<4x1xf32, #tpu.memory_space<vmem>>, %arg7: memref<1x4x256xf32, #tpu.memory_space<vmem>>) attributes {dimension_semantics = [#tpu.dimension_semantics<parallel>], iteration_bounds = array<i64: 2>, scalar_prefetch = 0 : i64, scratch_operands = 0 : i64, tpu.core_type = #tpu.core_type<tc>, window_params = [{transform_indices = @transform_0, window_bounds = array<i64: 1, 4, 256>}, {pipeline_mode = #tpu.pipeline_mode<synchronous>, transform_indices = @transform_1, window_bounds = array<i64: 9, 256>}, {pipeline_mode = #tpu.pipeline_mode<synchronous>, transform_indices = @transform_2, window_bounds = array<i64: 3, 9, 4, 4>}, {pipeline_mode = #tpu.pipeline_mode<synchronous>, transform_indices = @transform_3, window_bounds = array<i64: 3, 4, 1>}, {pipeline_mode = #tpu.pipeline_mode<synchronous>, transform_indices = @transform_4, window_bounds = array<i64: 2, 4, 4>}, {pipeline_mode = #tpu.pipeline_mode<synchronous>, transform_indices = @transform_5, window_bounds = array<i64: 4, 1>}, {transform_indices = @transform_6, window_bounds = array<i64: 1, 4, 256>}]} {
    %c0 = arith.constant 0 : index
    %c0_0 = arith.constant 0 : index
    %0 = vector.load %arg2[%c0, %c0_0] : memref<9x256xf32, #tpu.memory_space<vmem>>, vector<9x256xf32>
    %1 = vector.extract_strided_slice %0 {offsets = [0, 0], sizes = [1, 256], strides = [1, 1]} : vector<9x256xf32> to vector<1x256xf32>
    %2 = vector.shape_cast %1 : vector<1x256xf32> to vector<1x256xf32>
    %3 = vector.broadcast %2 : vector<1x256xf32> to vector<4x256xf32>
    %4 = vector.extract_strided_slice %0 {offsets = [1, 0], sizes = [1, 256], strides = [1, 1]} : vector<9x256xf32> to vector<1x256xf32>
    %5 = vector.shape_cast %4 : vector<1x256xf32> to vector<1x256xf32>
    %6 = vector.broadcast %5 : vector<1x256xf32> to vector<4x256xf32>
    %7 = vector.extract_strided_slice %0 {offsets = [2, 0], sizes = [1, 256], strides = [1, 1]} : vector<9x256xf32> to vector<1x256xf32>
    %8 = vector.shape_cast %7 : vector<1x256xf32> to vector<1x256xf32>
    %9 = vector.broadcast %8 : vector<1x256xf32> to vector<4x256xf32>
    %10 = vector.extract_strided_slice %0 {offsets = [3, 0], sizes = [1, 256], strides = [1, 1]} : vector<9x256xf32> to vector<1x256xf32>
    %11 = vector.shape_cast %10 : vector<1x256xf32> to vector<1x256xf32>
    %12 = vector.broadcast %11 : vector<1x256xf32> to vector<4x256xf32>
    %13 = vector.extract_strided_slice %0 {offsets = [5, 0], sizes = [1, 256], strides = [1, 1]} : vector<9x256xf32> to vector<1x256xf32>
    %14 = vector.shape_cast %13 : vector<1x256xf32> to vector<1x256xf32>
    %15 = vector.broadcast %14 : vector<1x256xf32> to vector<4x256xf32>
    %16 = vector.extract_strided_slice %0 {offsets = [6, 0], sizes = [1, 256], strides = [1, 1]} : vector<9x256xf32> to vector<1x256xf32>
    %17 = vector.shape_cast %16 : vector<1x256xf32> to vector<1x256xf32>
    %18 = vector.broadcast %17 : vector<1x256xf32> to vector<4x256xf32>
    %19 = vector.extract_strided_slice %0 {offsets = [7, 0], sizes = [1, 256], strides = [1, 1]} : vector<9x256xf32> to vector<1x256xf32>
    %20 = vector.shape_cast %19 : vector<1x256xf32> to vector<1x256xf32>
    %21 = vector.broadcast %20 : vector<1x256xf32> to vector<4x256xf32>
    %22 = vector.extract_strided_slice %0 {offsets = [8, 0], sizes = [1, 256], strides = [1, 1]} : vector<9x256xf32> to vector<1x256xf32>
    %23 = vector.shape_cast %22 : vector<1x256xf32> to vector<1x256xf32>
    %24 = vector.broadcast %23 : vector<1x256xf32> to vector<4x256xf32>
    %c0_1 = arith.constant 0 : index
    %c0_2 = arith.constant 0 : index
    %c0_3 = arith.constant 0 : index
    %25 = vector.load %arg1[%c0_1, %c0_2, %c0_3] : memref<1x4x256xf32, #tpu.memory_space<vmem>>, vector<1x4x256xf32>
    %26 = vector.shape_cast %25 : vector<1x4x256xf32> to vector<4x256xf32>
    %c17_i32 = arith.constant 17 : i32
    %27 = tpu.dynamic_rotate %26 by %c17_i32 dim 1 : vector<4x256xf32>, i32 -> vector<4x256xf32>
    %28 = arith.mulf %27, %3 : vector<4x256xf32>
    %c0_4 = arith.constant 0 : index
    %c0_5 = arith.constant 0 : index
    %c0_6 = arith.constant 0 : index
    %c0_7 = arith.constant 0 : index
    %29 = vector.load %arg3[%c0_4, %c0_5, %c0_6, %c0_7] : memref<3x9x4x4xf32, #tpu.memory_space<vmem>>, vector<1x1x4x4xf32>
    %30 = vector.shape_cast %29 : vector<1x1x4x4xf32> to vector<4x4xf32>
    %cst = arith.constant dense<0.000000e+00> : vector<4x256xf32>
    %31 = tpu.matmul %30, %28, %cst {dimension_numbers = #tpu.dot_dimension_numbers<[1], [0], [0], [1], [0, 0, 1, 1], [], []>} : vector<4x4xf32>, vector<4x256xf32>, vector<4x256xf32> -> vector<4x256xf32>
    %c16_i32 = arith.constant 16 : i32
    %32 = tpu.dynamic_rotate %26 by %c16_i32 dim 1 : vector<4x256xf32>, i32 -> vector<4x256xf32>
    %33 = arith.mulf %32, %6 : vector<4x256xf32>
    %c0_8 = arith.constant 0 : index
    %c1 = arith.constant 1 : index
    %c0_9 = arith.constant 0 : index
    %c0_10 = arith.constant 0 : index
    %34 = vector.load %arg3[%c0_8, %c1, %c0_9, %c0_10] : memref<3x9x4x4xf32, #tpu.memory_space<vmem>>, vector<1x1x4x4xf32>
    %35 = vector.shape_cast %34 : vector<1x1x4x4xf32> to vector<4x4xf32>
    %cst_11 = arith.constant dense<0.000000e+00> : vector<4x256xf32>
    %36 = tpu.matmul %35, %33, %cst_11 {dimension_numbers = #tpu.dot_dimension_numbers<[1], [0], [0], [1], [0, 0, 1, 1], [], []>} : vector<4x4xf32>, vector<4x256xf32>, vector<4x256xf32> -> vector<4x256xf32>
    %37 = arith.addf %31, %36 : vector<4x256xf32>
    %c15_i32 = arith.constant 15 : i32
    %38 = tpu.dynamic_rotate %26 by %c15_i32 dim 1 : vector<4x256xf32>, i32 -> vector<4x256xf32>
    %39 = arith.mulf %38, %9 : vector<4x256xf32>
    %c0_12 = arith.constant 0 : index
    %c2 = arith.constant 2 : index
    %c0_13 = arith.constant 0 : index
    %c0_14 = arith.constant 0 : index
    %40 = vector.load %arg3[%c0_12, %c2, %c0_13, %c0_14] : memref<3x9x4x4xf32, #tpu.memory_space<vmem>>, vector<1x1x4x4xf32>
    %41 = vector.shape_cast %40 : vector<1x1x4x4xf32> to vector<4x4xf32>
    %cst_15 = arith.constant dense<0.000000e+00> : vector<4x256xf32>
    %42 = tpu.matmul %41, %39, %cst_15 {dimension_numbers = #tpu.dot_dimension_numbers<[1], [0], [0], [1], [0, 0, 1, 1], [], []>} : vector<4x4xf32>, vector<4x256xf32>, vector<4x256xf32> -> vector<4x256xf32>
    %43 = arith.addf %37, %42 : vector<4x256xf32>
    %c1_i32 = arith.constant 1 : i32
    %44 = tpu.dynamic_rotate %26 by %c1_i32 dim 1 : vector<4x256xf32>, i32 -> vector<4x256xf32>
    %45 = arith.mulf %44, %12 : vector<4x256xf32>
    %c0_16 = arith.constant 0 : index
    %c3 = arith.constant 3 : index
    %c0_17 = arith.constant 0 : index
    %c0_18 = arith.constant 0 : index
    %46 = vector.load %arg3[%c0_16, %c3, %c0_17, %c0_18] : memref<3x9x4x4xf32, #tpu.memory_space<vmem>>, vector<1x1x4x4xf32>
    %47 = vector.shape_cast %46 : vector<1x1x4x4xf32> to vector<4x4xf32>
    %cst_19 = arith.constant dense<0.000000e+00> : vector<4x256xf32>
    %48 = tpu.matmul %47, %45, %cst_19 {dimension_numbers = #tpu.dot_dimension_numbers<[1], [0], [0], [1], [0, 0, 1, 1], [], []>} : vector<4x4xf32>, vector<4x256xf32>, vector<4x256xf32> -> vector<4x256xf32>
    %49 = arith.addf %43, %48 : vector<4x256xf32>
    %c0_20 = arith.constant 0 : index
    %c4 = arith.constant 4 : index
    %c0_21 = arith.constant 0 : index
    %c0_22 = arith.constant 0 : index
    %50 = vector.load %arg3[%c0_20, %c4, %c0_21, %c0_22] : memref<3x9x4x4xf32, #tpu.memory_space<vmem>>, vector<1x1x4x4xf32>
    %51 = vector.shape_cast %50 : vector<1x1x4x4xf32> to vector<4x4xf32>
    %cst_23 = arith.constant dense<0.000000e+00> : vector<4x256xf32>
    %52 = tpu.matmul %51, %26, %cst_23 {dimension_numbers = #tpu.dot_dimension_numbers<[1], [0], [0], [1], [0, 0, 1, 1], [], []>} : vector<4x4xf32>, vector<4x256xf32>, vector<4x256xf32> -> vector<4x256xf32>
    %53 = arith.addf %49, %52 : vector<4x256xf32>
    %c255_i32 = arith.constant 255 : i32
    %54 = tpu.dynamic_rotate %26 by %c255_i32 dim 1 : vector<4x256xf32>, i32 -> vector<4x256xf32>
    %55 = arith.mulf %54, %15 : vector<4x256xf32>
    %c0_24 = arith.constant 0 : index
    %c5 = arith.constant 5 : index
    %c0_25 = arith.constant 0 : index
    %c0_26 = arith.constant 0 : index
    %56 = vector.load %arg3[%c0_24, %c5, %c0_25, %c0_26] : memref<3x9x4x4xf32, #tpu.memory_space<vmem>>, vector<1x1x4x4xf32>
    %57 = vector.shape_cast %56 : vector<1x1x4x4xf32> to vector<4x4xf32>
    %cst_27 = arith.constant dense<0.000000e+00> : vector<4x256xf32>
    %58 = tpu.matmul %57, %55, %cst_27 {dimension_numbers = #tpu.dot_dimension_numbers<[1], [0], [0], [1], [0, 0, 1, 1], [], []>} : vector<4x4xf32>, vector<4x256xf32>, vector<4x256xf32> -> vector<4x256xf32>
    %59 = arith.addf %53, %58 : vector<4x256xf32>
    %c241_i32 = arith.constant 241 : i32
    %60 = tpu.dynamic_rotate %26 by %c241_i32 dim 1 : vector<4x256xf32>, i32 -> vector<4x256xf32>
    %61 = arith.mulf %60, %18 : vector<4x256xf32>
    %c0_28 = arith.constant 0 : index
    %c6 = arith.constant 6 : index
    %c0_29 = arith.constant 0 : index
    %c0_30 = arith.constant 0 : index
    %62 = vector.load %arg3[%c0_28, %c6, %c0_29, %c0_30] : memref<3x9x4x4xf32, #tpu.memory_space<vmem>>, vector<1x1x4x4xf32>
    %63 = vector.shape_cast %62 : vector<1x1x4x4xf32> to vector<4x4xf32>
    %cst_31 = arith.constant dense<0.000000e+00> : vector<4x256xf32>
    %64 = tpu.matmul %63, %61, %cst_31 {dimension_numbers = #tpu.dot_dimension_numbers<[1], [0], [0], [1], [0, 0, 1, 1], [], []>} : vector<4x4xf32>, vector<4x256xf32>, vector<4x256xf32> -> vector<4x256xf32>
    %65 = arith.addf %59, %64 : vector<4x256xf32>
    %c240_i32 = arith.constant 240 : i32
    %66 = tpu.dynamic_rotate %26 by %c240_i32 dim 1 : vector<4x256xf32>, i32 -> vector<4x256xf32>
    %67 = arith.mulf %66, %21 : vector<4x256xf32>
    %c0_32 = arith.constant 0 : index
    %c7 = arith.constant 7 : index
    %c0_33 = arith.constant 0 : index
    %c0_34 = arith.constant 0 : index
    %68 = vector.load %arg3[%c0_32, %c7, %c0_33, %c0_34] : memref<3x9x4x4xf32, #tpu.memory_space<vmem>>, vector<1x1x4x4xf32>
    %69 = vector.shape_cast %68 : vector<1x1x4x4xf32> to vector<4x4xf32>
    %cst_35 = arith.constant dense<0.000000e+00> : vector<4x256xf32>
    %70 = tpu.matmul %69, %67, %cst_35 {dimension_numbers = #tpu.dot_dimension_numbers<[1], [0], [0], [1], [0, 0, 1, 1], [], []>} : vector<4x4xf32>, vector<4x256xf32>, vector<4x256xf32> -> vector<4x256xf32>
    %71 = arith.addf %65, %70 : vector<4x256xf32>
    %c239_i32 = arith.constant 239 : i32
    %72 = tpu.dynamic_rotate %26 by %c239_i32 dim 1 : vector<4x256xf32>, i32 -> vector<4x256xf32>
    %73 = arith.mulf %72, %24 : vector<4x256xf32>
    %c0_36 = arith.constant 0 : index
    %c8 = arith.constant 8 : index
    %c0_37 = arith.constant 0 : index
    %c0_38 = arith.constant 0 : index
    %74 = vector.load %arg3[%c0_36, %c8, %c0_37, %c0_38] : memref<3x9x4x4xf32, #tpu.memory_space<vmem>>, vector<1x1x4x4xf32>
    %75 = vector.shape_cast %74 : vector<1x1x4x4xf32> to vector<4x4xf32>
    %cst_39 = arith.constant dense<0.000000e+00> : vector<4x256xf32>
    %76 = tpu.matmul %75, %73, %cst_39 {dimension_numbers = #tpu.dot_dimension_numbers<[1], [0], [0], [1], [0, 0, 1, 1], [], []>} : vector<4x4xf32>, vector<4x256xf32>, vector<4x256xf32> -> vector<4x256xf32>
    %77 = arith.addf %71, %76 : vector<4x256xf32>
    %c0_40 = arith.constant 0 : index
    %c0_41 = arith.constant 0 : index
    %c0_42 = arith.constant 0 : index
    %78 = vector.load %arg4[%c0_40, %c0_41, %c0_42] : memref<3x4x1xf32, #tpu.memory_space<vmem>>, vector<1x4x1xf32>
    %79 = vector.shape_cast %78 : vector<1x4x1xf32> to vector<4x1xf32>
    %80 = vector.broadcast %79 : vector<4x1xf32> to vector<4x256xf32>
    %81 = arith.addf %77, %80 : vector<4x256xf32>
    %cst_43 = arith.constant 0.000000e+00 : f32
    %82 = vector.broadcast %cst_43 : f32 to vector<4x256xf32>
    %83 = arith.maximumf %81, %82 : vector<4x256xf32>
    %c17_i32_44 = arith.constant 17 : i32
    %84 = tpu.dynamic_rotate %83 by %c17_i32_44 dim 1 : vector<4x256xf32>, i32 -> vector<4x256xf32>
    %85 = arith.mulf %84, %3 : vector<4x256xf32>
    %c1_45 = arith.constant 1 : index
    %c0_46 = arith.constant 0 : index
    %c0_47 = arith.constant 0 : index
    %c0_48 = arith.constant 0 : index
    %86 = vector.load %arg3[%c1_45, %c0_46, %c0_47, %c0_48] : memref<3x9x4x4xf32, #tpu.memory_space<vmem>>, vector<1x1x4x4xf32>
    %87 = vector.shape_cast %86 : vector<1x1x4x4xf32> to vector<4x4xf32>
    %cst_49 = arith.constant dense<0.000000e+00> : vector<4x256xf32>
    %88 = tpu.matmul %87, %85, %cst_49 {dimension_numbers = #tpu.dot_dimension_numbers<[1], [0], [0], [1], [0, 0, 1, 1], [], []>} : vector<4x4xf32>, vector<4x256xf32>, vector<4x256xf32> -> vector<4x256xf32>
    %c16_i32_50 = arith.constant 16 : i32
    %89 = tpu.dynamic_rotate %83 by %c16_i32_50 dim 1 : vector<4x256xf32>, i32 -> vector<4x256xf32>
    %90 = arith.mulf %89, %6 : vector<4x256xf32>
    %c1_51 = arith.constant 1 : index
    %c1_52 = arith.constant 1 : index
    %c0_53 = arith.constant 0 : index
    %c0_54 = arith.constant 0 : index
    %91 = vector.load %arg3[%c1_51, %c1_52, %c0_53, %c0_54] : memref<3x9x4x4xf32, #tpu.memory_space<vmem>>, vector<1x1x4x4xf32>
    %92 = vector.shape_cast %91 : vector<1x1x4x4xf32> to vector<4x4xf32>
    %cst_55 = arith.constant dense<0.000000e+00> : vector<4x256xf32>
    %93 = tpu.matmul %92, %90, %cst_55 {dimension_numbers = #tpu.dot_dimension_numbers<[1], [0], [0], [1], [0, 0, 1, 1], [], []>} : vector<4x4xf32>, vector<4x256xf32>, vector<4x256xf32> -> vector<4x256xf32>
    %94 = arith.addf %88, %93 : vector<4x256xf32>
    %c15_i32_56 = arith.constant 15 : i32
    %95 = tpu.dynamic_rotate %83 by %c15_i32_56 dim 1 : vector<4x256xf32>, i32 -> vector<4x256xf32>
    %96 = arith.mulf %95, %9 : vector<4x256xf32>
    %c1_57 = arith.constant 1 : index
    %c2_58 = arith.constant 2 : index
    %c0_59 = arith.constant 0 : index
    %c0_60 = arith.constant 0 : index
    %97 = vector.load %arg3[%c1_57, %c2_58, %c0_59, %c0_60] : memref<3x9x4x4xf32, #tpu.memory_space<vmem>>, vector<1x1x4x4xf32>
    %98 = vector.shape_cast %97 : vector<1x1x4x4xf32> to vector<4x4xf32>
    %cst_61 = arith.constant dense<0.000000e+00> : vector<4x256xf32>
    %99 = tpu.matmul %98, %96, %cst_61 {dimension_numbers = #tpu.dot_dimension_numbers<[1], [0], [0], [1], [0, 0, 1, 1], [], []>} : vector<4x4xf32>, vector<4x256xf32>, vector<4x256xf32> -> vector<4x256xf32>
    %100 = arith.addf %94, %99 : vector<4x256xf32>
    %c1_i32_62 = arith.constant 1 : i32
    %101 = tpu.dynamic_rotate %83 by %c1_i32_62 dim 1 : vector<4x256xf32>, i32 -> vector<4x256xf32>
    %102 = arith.mulf %101, %12 : vector<4x256xf32>
    %c1_63 = arith.constant 1 : index
    %c3_64 = arith.constant 3 : index
    %c0_65 = arith.constant 0 : index
    %c0_66 = arith.constant 0 : index
    %103 = vector.load %arg3[%c1_63, %c3_64, %c0_65, %c0_66] : memref<3x9x4x4xf32, #tpu.memory_space<vmem>>, vector<1x1x4x4xf32>
    %104 = vector.shape_cast %103 : vector<1x1x4x4xf32> to vector<4x4xf32>
    %cst_67 = arith.constant dense<0.000000e+00> : vector<4x256xf32>
    %105 = tpu.matmul %104, %102, %cst_67 {dimension_numbers = #tpu.dot_dimension_numbers<[1], [0], [0], [1], [0, 0, 1, 1], [], []>} : vector<4x4xf32>, vector<4x256xf32>, vector<4x256xf32> -> vector<4x256xf32>
    %106 = arith.addf %100, %105 : vector<4x256xf32>
    %c1_68 = arith.constant 1 : index
    %c4_69 = arith.constant 4 : index
    %c0_70 = arith.constant 0 : index
    %c0_71 = arith.constant 0 : index
    %107 = vector.load %arg3[%c1_68, %c4_69, %c0_70, %c0_71] : memref<3x9x4x4xf32, #tpu.memory_space<vmem>>, vector<1x1x4x4xf32>
    %108 = vector.shape_cast %107 : vector<1x1x4x4xf32> to vector<4x4xf32>
    %cst_72 = arith.constant dense<0.000000e+00> : vector<4x256xf32>
    %109 = tpu.matmul %108, %83, %cst_72 {dimension_numbers = #tpu.dot_dimension_numbers<[1], [0], [0], [1], [0, 0, 1, 1], [], []>} : vector<4x4xf32>, vector<4x256xf32>, vector<4x256xf32> -> vector<4x256xf32>
    %110 = arith.addf %106, %109 : vector<4x256xf32>
    %c255_i32_73 = arith.constant 255 : i32
    %111 = tpu.dynamic_rotate %83 by %c255_i32_73 dim 1 : vector<4x256xf32>, i32 -> vector<4x256xf32>
    %112 = arith.mulf %111, %15 : vector<4x256xf32>
    %c1_74 = arith.constant 1 : index
    %c5_75 = arith.constant 5 : index
    %c0_76 = arith.constant 0 : index
    %c0_77 = arith.constant 0 : index
    %113 = vector.load %arg3[%c1_74, %c5_75, %c0_76, %c0_77] : memref<3x9x4x4xf32, #tpu.memory_space<vmem>>, vector<1x1x4x4xf32>
    %114 = vector.shape_cast %113 : vector<1x1x4x4xf32> to vector<4x4xf32>
    %cst_78 = arith.constant dense<0.000000e+00> : vector<4x256xf32>
    %115 = tpu.matmul %114, %112, %cst_78 {dimension_numbers = #tpu.dot_dimension_numbers<[1], [0], [0], [1], [0, 0, 1, 1], [], []>} : vector<4x4xf32>, vector<4x256xf32>, vector<4x256xf32> -> vector<4x256xf32>
    %116 = arith.addf %110, %115 : vector<4x256xf32>
    %c241_i32_79 = arith.constant 241 : i32
    %117 = tpu.dynamic_rotate %83 by %c241_i32_79 dim 1 : vector<4x256xf32>, i32 -> vector<4x256xf32>
    %118 = arith.mulf %117, %18 : vector<4x256xf32>
    %c1_80 = arith.constant 1 : index
    %c6_81 = arith.constant 6 : index
    %c0_82 = arith.constant 0 : index
    %c0_83 = arith.constant 0 : index
    %119 = vector.load %arg3[%c1_80, %c6_81, %c0_82, %c0_83] : memref<3x9x4x4xf32, #tpu.memory_space<vmem>>, vector<1x1x4x4xf32>
    %120 = vector.shape_cast %119 : vector<1x1x4x4xf32> to vector<4x4xf32>
    %cst_84 = arith.constant dense<0.000000e+00> : vector<4x256xf32>
    %121 = tpu.matmul %120, %118, %cst_84 {dimension_numbers = #tpu.dot_dimension_numbers<[1], [0], [0], [1], [0, 0, 1, 1], [], []>} : vector<4x4xf32>, vector<4x256xf32>, vector<4x256xf32> -> vector<4x256xf32>
    %122 = arith.addf %116, %121 : vector<4x256xf32>
    %c240_i32_85 = arith.constant 240 : i32
    %123 = tpu.dynamic_rotate %83 by %c240_i32_85 dim 1 : vector<4x256xf32>, i32 -> vector<4x256xf32>
    %124 = arith.mulf %123, %21 : vector<4x256xf32>
    %c1_86 = arith.constant 1 : index
    %c7_87 = arith.constant 7 : index
    %c0_88 = arith.constant 0 : index
    %c0_89 = arith.constant 0 : index
    %125 = vector.load %arg3[%c1_86, %c7_87, %c0_88, %c0_89] : memref<3x9x4x4xf32, #tpu.memory_space<vmem>>, vector<1x1x4x4xf32>
    %126 = vector.shape_cast %125 : vector<1x1x4x4xf32> to vector<4x4xf32>
    %cst_90 = arith.constant dense<0.000000e+00> : vector<4x256xf32>
    %127 = tpu.matmul %126, %124, %cst_90 {dimension_numbers = #tpu.dot_dimension_numbers<[1], [0], [0], [1], [0, 0, 1, 1], [], []>} : vector<4x4xf32>, vector<4x256xf32>, vector<4x256xf32> -> vector<4x256xf32>
    %128 = arith.addf %122, %127 : vector<4x256xf32>
    %c239_i32_91 = arith.constant 239 : i32
    %129 = tpu.dynamic_rotate %83 by %c239_i32_91 dim 1 : vector<4x256xf32>, i32 -> vector<4x256xf32>
    %130 = arith.mulf %129, %24 : vector<4x256xf32>
    %c1_92 = arith.constant 1 : index
    %c8_93 = arith.constant 8 : index
    %c0_94 = arith.constant 0 : index
    %c0_95 = arith.constant 0 : index
    %131 = vector.load %arg3[%c1_92, %c8_93, %c0_94, %c0_95] : memref<3x9x4x4xf32, #tpu.memory_space<vmem>>, vector<1x1x4x4xf32>
    %132 = vector.shape_cast %131 : vector<1x1x4x4xf32> to vector<4x4xf32>
    %cst_96 = arith.constant dense<0.000000e+00> : vector<4x256xf32>
    %133 = tpu.matmul %132, %130, %cst_96 {dimension_numbers = #tpu.dot_dimension_numbers<[1], [0], [0], [1], [0, 0, 1, 1], [], []>} : vector<4x4xf32>, vector<4x256xf32>, vector<4x256xf32> -> vector<4x256xf32>
    %134 = arith.addf %128, %133 : vector<4x256xf32>
    %c1_97 = arith.constant 1 : index
    %c0_98 = arith.constant 0 : index
    %c0_99 = arith.constant 0 : index
    %135 = vector.load %arg4[%c1_97, %c0_98, %c0_99] : memref<3x4x1xf32, #tpu.memory_space<vmem>>, vector<1x4x1xf32>
    %136 = vector.shape_cast %135 : vector<1x4x1xf32> to vector<4x1xf32>
    %137 = vector.broadcast %136 : vector<4x1xf32> to vector<4x256xf32>
    %138 = arith.addf %134, %137 : vector<4x256xf32>
    %cst_100 = arith.constant 0.000000e+00 : f32
    %139 = vector.broadcast %cst_100 : f32 to vector<4x256xf32>
    %140 = arith.maximumf %138, %139 : vector<4x256xf32>
    %c17_i32_101 = arith.constant 17 : i32
    %141 = tpu.dynamic_rotate %140 by %c17_i32_101 dim 1 : vector<4x256xf32>, i32 -> vector<4x256xf32>
    %142 = arith.mulf %141, %3 : vector<4x256xf32>
    %c2_102 = arith.constant 2 : index
    %c0_103 = arith.constant 0 : index
    %c0_104 = arith.constant 0 : index
    %c0_105 = arith.constant 0 : index
    %143 = vector.load %arg3[%c2_102, %c0_103, %c0_104, %c0_105] : memref<3x9x4x4xf32, #tpu.memory_space<vmem>>, vector<1x1x4x4xf32>
    %144 = vector.shape_cast %143 : vector<1x1x4x4xf32> to vector<4x4xf32>
    %cst_106 = arith.constant dense<0.000000e+00> : vector<4x256xf32>
    %145 = tpu.matmul %144, %142, %cst_106 {dimension_numbers = #tpu.dot_dimension_numbers<[1], [0], [0], [1], [0, 0, 1, 1], [], []>} : vector<4x4xf32>, vector<4x256xf32>, vector<4x256xf32> -> vector<4x256xf32>
    %c16_i32_107 = arith.constant 16 : i32
    %146 = tpu.dynamic_rotate %140 by %c16_i32_107 dim 1 : vector<4x256xf32>, i32 -> vector<4x256xf32>
    %147 = arith.mulf %146, %6 : vector<4x256xf32>
    %c2_108 = arith.constant 2 : index
    %c1_109 = arith.constant 1 : index
    %c0_110 = arith.constant 0 : index
    %c0_111 = arith.constant 0 : index
    %148 = vector.load %arg3[%c2_108, %c1_109, %c0_110, %c0_111] : memref<3x9x4x4xf32, #tpu.memory_space<vmem>>, vector<1x1x4x4xf32>
    %149 = vector.shape_cast %148 : vector<1x1x4x4xf32> to vector<4x4xf32>
    %cst_112 = arith.constant dense<0.000000e+00> : vector<4x256xf32>
    %150 = tpu.matmul %149, %147, %cst_112 {dimension_numbers = #tpu.dot_dimension_numbers<[1], [0], [0], [1], [0, 0, 1, 1], [], []>} : vector<4x4xf32>, vector<4x256xf32>, vector<4x256xf32> -> vector<4x256xf32>
    %151 = arith.addf %145, %150 : vector<4x256xf32>
    %c15_i32_113 = arith.constant 15 : i32
    %152 = tpu.dynamic_rotate %140 by %c15_i32_113 dim 1 : vector<4x256xf32>, i32 -> vector<4x256xf32>
    %153 = arith.mulf %152, %9 : vector<4x256xf32>
    %c2_114 = arith.constant 2 : index
    %c2_115 = arith.constant 2 : index
    %c0_116 = arith.constant 0 : index
    %c0_117 = arith.constant 0 : index
    %154 = vector.load %arg3[%c2_114, %c2_115, %c0_116, %c0_117] : memref<3x9x4x4xf32, #tpu.memory_space<vmem>>, vector<1x1x4x4xf32>
    %155 = vector.shape_cast %154 : vector<1x1x4x4xf32> to vector<4x4xf32>
    %cst_118 = arith.constant dense<0.000000e+00> : vector<4x256xf32>
    %156 = tpu.matmul %155, %153, %cst_118 {dimension_numbers = #tpu.dot_dimension_numbers<[1], [0], [0], [1], [0, 0, 1, 1], [], []>} : vector<4x4xf32>, vector<4x256xf32>, vector<4x256xf32> -> vector<4x256xf32>
    %157 = arith.addf %151, %156 : vector<4x256xf32>
    %c1_i32_119 = arith.constant 1 : i32
    %158 = tpu.dynamic_rotate %140 by %c1_i32_119 dim 1 : vector<4x256xf32>, i32 -> vector<4x256xf32>
    %159 = arith.mulf %158, %12 : vector<4x256xf32>
    %c2_120 = arith.constant 2 : index
    %c3_121 = arith.constant 3 : index
    %c0_122 = arith.constant 0 : index
    %c0_123 = arith.constant 0 : index
    %160 = vector.load %arg3[%c2_120, %c3_121, %c0_122, %c0_123] : memref<3x9x4x4xf32, #tpu.memory_space<vmem>>, vector<1x1x4x4xf32>
    %161 = vector.shape_cast %160 : vector<1x1x4x4xf32> to vector<4x4xf32>
    %cst_124 = arith.constant dense<0.000000e+00> : vector<4x256xf32>
    %162 = tpu.matmul %161, %159, %cst_124 {dimension_numbers = #tpu.dot_dimension_numbers<[1], [0], [0], [1], [0, 0, 1, 1], [], []>} : vector<4x4xf32>, vector<4x256xf32>, vector<4x256xf32> -> vector<4x256xf32>
    %163 = arith.addf %157, %162 : vector<4x256xf32>
    %c2_125 = arith.constant 2 : index
    %c4_126 = arith.constant 4 : index
    %c0_127 = arith.constant 0 : index
    %c0_128 = arith.constant 0 : index
    %164 = vector.load %arg3[%c2_125, %c4_126, %c0_127, %c0_128] : memref<3x9x4x4xf32, #tpu.memory_space<vmem>>, vector<1x1x4x4xf32>
    %165 = vector.shape_cast %164 : vector<1x1x4x4xf32> to vector<4x4xf32>
    %cst_129 = arith.constant dense<0.000000e+00> : vector<4x256xf32>
    %166 = tpu.matmul %165, %140, %cst_129 {dimension_numbers = #tpu.dot_dimension_numbers<[1], [0], [0], [1], [0, 0, 1, 1], [], []>} : vector<4x4xf32>, vector<4x256xf32>, vector<4x256xf32> -> vector<4x256xf32>
    %167 = arith.addf %163, %166 : vector<4x256xf32>
    %c255_i32_130 = arith.constant 255 : i32
    %168 = tpu.dynamic_rotate %140 by %c255_i32_130 dim 1 : vector<4x256xf32>, i32 -> vector<4x256xf32>
    %169 = arith.mulf %168, %15 : vector<4x256xf32>
    %c2_131 = arith.constant 2 : index
    %c5_132 = arith.constant 5 : index
    %c0_133 = arith.constant 0 : index
    %c0_134 = arith.constant 0 : index
    %170 = vector.load %arg3[%c2_131, %c5_132, %c0_133, %c0_134] : memref<3x9x4x4xf32, #tpu.memory_space<vmem>>, vector<1x1x4x4xf32>
    %171 = vector.shape_cast %170 : vector<1x1x4x4xf32> to vector<4x4xf32>
    %cst_135 = arith.constant dense<0.000000e+00> : vector<4x256xf32>
    %172 = tpu.matmul %171, %169, %cst_135 {dimension_numbers = #tpu.dot_dimension_numbers<[1], [0], [0], [1], [0, 0, 1, 1], [], []>} : vector<4x4xf32>, vector<4x256xf32>, vector<4x256xf32> -> vector<4x256xf32>
    %173 = arith.addf %167, %172 : vector<4x256xf32>
    %c241_i32_136 = arith.constant 241 : i32
    %174 = tpu.dynamic_rotate %140 by %c241_i32_136 dim 1 : vector<4x256xf32>, i32 -> vector<4x256xf32>
    %175 = arith.mulf %174, %18 : vector<4x256xf32>
    %c2_137 = arith.constant 2 : index
    %c6_138 = arith.constant 6 : index
    %c0_139 = arith.constant 0 : index
    %c0_140 = arith.constant 0 : index
    %176 = vector.load %arg3[%c2_137, %c6_138, %c0_139, %c0_140] : memref<3x9x4x4xf32, #tpu.memory_space<vmem>>, vector<1x1x4x4xf32>
    %177 = vector.shape_cast %176 : vector<1x1x4x4xf32> to vector<4x4xf32>
    %cst_141 = arith.constant dense<0.000000e+00> : vector<4x256xf32>
    %178 = tpu.matmul %177, %175, %cst_141 {dimension_numbers = #tpu.dot_dimension_numbers<[1], [0], [0], [1], [0, 0, 1, 1], [], []>} : vector<4x4xf32>, vector<4x256xf32>, vector<4x256xf32> -> vector<4x256xf32>
    %179 = arith.addf %173, %178 : vector<4x256xf32>
    %c240_i32_142 = arith.constant 240 : i32
    %180 = tpu.dynamic_rotate %140 by %c240_i32_142 dim 1 : vector<4x256xf32>, i32 -> vector<4x256xf32>
    %181 = arith.mulf %180, %21 : vector<4x256xf32>
    %c2_143 = arith.constant 2 : index
    %c7_144 = arith.constant 7 : index
    %c0_145 = arith.constant 0 : index
    %c0_146 = arith.constant 0 : index
    %182 = vector.load %arg3[%c2_143, %c7_144, %c0_145, %c0_146] : memref<3x9x4x4xf32, #tpu.memory_space<vmem>>, vector<1x1x4x4xf32>
    %183 = vector.shape_cast %182 : vector<1x1x4x4xf32> to vector<4x4xf32>
    %cst_147 = arith.constant dense<0.000000e+00> : vector<4x256xf32>
    %184 = tpu.matmul %183, %181, %cst_147 {dimension_numbers = #tpu.dot_dimension_numbers<[1], [0], [0], [1], [0, 0, 1, 1], [], []>} : vector<4x4xf32>, vector<4x256xf32>, vector<4x256xf32> -> vector<4x256xf32>
    %185 = arith.addf %179, %184 : vector<4x256xf32>
    %c239_i32_148 = arith.constant 239 : i32
    %186 = tpu.dynamic_rotate %140 by %c239_i32_148 dim 1 : vector<4x256xf32>, i32 -> vector<4x256xf32>
    %187 = arith.mulf %186, %24 : vector<4x256xf32>
    %c2_149 = arith.constant 2 : index
    %c8_150 = arith.constant 8 : index
    %c0_151 = arith.constant 0 : index
    %c0_152 = arith.constant 0 : index
    %188 = vector.load %arg3[%c2_149, %c8_150, %c0_151, %c0_152] : memref<3x9x4x4xf32, #tpu.memory_space<vmem>>, vector<1x1x4x4xf32>
    %189 = vector.shape_cast %188 : vector<1x1x4x4xf32> to vector<4x4xf32>
    %cst_153 = arith.constant dense<0.000000e+00> : vector<4x256xf32>
    %190 = tpu.matmul %189, %187, %cst_153 {dimension_numbers = #tpu.dot_dimension_numbers<[1], [0], [0], [1], [0, 0, 1, 1], [], []>} : vector<4x4xf32>, vector<4x256xf32>, vector<4x256xf32> -> vector<4x256xf32>
    %191 = arith.addf %185, %190 : vector<4x256xf32>
    %c2_154 = arith.constant 2 : index
    %c0_155 = arith.constant 0 : index
    %c0_156 = arith.constant 0 : index
    %192 = vector.load %arg4[%c2_154, %c0_155, %c0_156] : memref<3x4x1xf32, #tpu.memory_space<vmem>>, vector<1x4x1xf32>
    %193 = vector.shape_cast %192 : vector<1x4x1xf32> to vector<4x1xf32>
    %194 = vector.broadcast %193 : vector<4x1xf32> to vector<4x256xf32>
    %195 = arith.addf %191, %194 : vector<4x256xf32>
    %cst_157 = arith.constant 0.000000e+00 : f32
    %196 = vector.broadcast %cst_157 : f32 to vector<4x256xf32>
    %197 = arith.maximumf %195, %196 : vector<4x256xf32>
    %c0_158 = arith.constant 0 : index
    %c0_159 = arith.constant 0 : index
    %c0_160 = arith.constant 0 : index
    %198 = vector.load %arg5[%c0_158, %c0_159, %c0_160] : memref<2x4x4xf32, #tpu.memory_space<vmem>>, vector<1x4x4xf32>
    %199 = vector.shape_cast %198 : vector<1x4x4xf32> to vector<4x4xf32>
    %cst_161 = arith.constant dense<0.000000e+00> : vector<4x256xf32>
    %200 = tpu.matmul %199, %197, %cst_161 {dimension_numbers = #tpu.dot_dimension_numbers<[1], [0], [0], [1], [0, 0, 1, 1], [], []>} : vector<4x4xf32>, vector<4x256xf32>, vector<4x256xf32> -> vector<4x256xf32>
    %c1_162 = arith.constant 1 : index
    %c0_163 = arith.constant 0 : index
    %c0_164 = arith.constant 0 : index
    %201 = vector.load %arg5[%c1_162, %c0_163, %c0_164] : memref<2x4x4xf32, #tpu.memory_space<vmem>>, vector<1x4x4xf32>
    %202 = vector.shape_cast %201 : vector<1x4x4xf32> to vector<4x4xf32>
    %cst_165 = arith.constant dense<0.000000e+00> : vector<4x256xf32>
    %203 = tpu.matmul %202, %26, %cst_165 {dimension_numbers = #tpu.dot_dimension_numbers<[1], [0], [0], [1], [0, 0, 1, 1], [], []>} : vector<4x4xf32>, vector<4x256xf32>, vector<4x256xf32> -> vector<4x256xf32>
    %204 = arith.addf %200, %203 : vector<4x256xf32>
    %c0_166 = arith.constant 0 : index
    %c0_167 = arith.constant 0 : index
    %205 = vector.load %arg6[%c0_166, %c0_167] : memref<4x1xf32, #tpu.memory_space<vmem>>, vector<4x1xf32>
    %206 = vector.broadcast %205 : vector<4x1xf32> to vector<4x256xf32>
    %207 = arith.addf %204, %206 : vector<4x256xf32>
    %c0_168 = arith.constant 0 : index
    %c0_169 = arith.constant 0 : index
    %c0_170 = arith.constant 0 : index
    %208 = vector.load %arg7[%c0_168, %c0_169, %c0_170] : memref<1x4x256xf32, #tpu.memory_space<vmem>>, vector<1x4x256xf32>
    %209 = vector.shape_cast %208 : vector<1x4x256xf32> to vector<4x256xf32>
    %210 = vector.shape_cast %207 : vector<4x256xf32> to vector<1x4x256xf32>
    tpu.vector_store %arg7[%c0_168, %c0_169, %c0_170], %210 {strides = array<i32>} : memref<1x4x256xf32, #tpu.memory_space<vmem>>, vector<1x4x256xf32>,
    return
  }
  func.func @transform_0(%arg0: i32) -> (i32, i32, i32) {
    %c0_i32 = arith.constant 0 : i32
    %c0_i32_0 = arith.constant 0 : i32
    %c0_i32_1 = arith.constant 0 : i32
    return %arg0, %c0_i32, %c0_i32_0 : i32, i32, i32
  }
  func.func @transform_1(%arg0: i32) -> (i32, i32) {
    %c0_i32 = arith.constant 0 : i32
    %c0_i32_0 = arith.constant 0 : i32
    %c0_i32_1 = arith.constant 0 : i32
    return %c0_i32, %c0_i32_0 : i32, i32
  }
  func.func @transform_2(%arg0: i32) -> (i32, i32, i32, i32) {
    %c0_i32 = arith.constant 0 : i32
    %c0_i32_0 = arith.constant 0 : i32
    %c0_i32_1 = arith.constant 0 : i32
    %c0_i32_2 = arith.constant 0 : i32
    %c0_i32_3 = arith.constant 0 : i32
    return %c0_i32, %c0_i32_0, %c0_i32_1, %c0_i32_2 : i32, i32, i32, i32
  }
  func.func @transform_3(%arg0: i32) -> (i32, i32, i32) {
    %c0_i32 = arith.constant 0 : i32
    %c0_i32_0 = arith.constant 0 : i32
    %c0_i32_1 = arith.constant 0 : i32
    %c0_i32_2 = arith.constant 0 : i32
    return %c0_i32, %c0_i32_0, %c0_i32_1 : i32, i32, i32
  }
  func.func @transform_4(%arg0: i32) -> (i32, i32, i32) {
    %c0_i32 = arith.constant 0 : i32
    %c0_i32_0 = arith.constant 0 : i32
    %c0_i32_1 = arith.constant 0 : i32
    %c0_i32_2 = arith.constant 0 : i32
    return %c0_i32, %c0_i32_0, %c0_i32_1 : i32, i32, i32
  }
  func.func @transform_5(%arg0: i32) -> (i32, i32) {
    %c0_i32 = arith.constant 0 : i32
    %c0_i32_0 = arith.constant 0 : i32
    %c0_i32_1 = arith.constant 0 : i32
    return %c0_i32, %c0_i32_0 : i32, i32
  }
  func.func @transform_6(%arg0: i32) -> (i32, i32, i32) {
    %c0_i32 = arith.constant 0 : i32
    %c0_i32_0 = arith.constant 0 : i32
    %c0_i32_1 = arith.constant 0 : i32
    return %arg0, %c0_i32, %c0_i32_0 : i32, i32, i32
  }
}

</mosaic_0001>

<bundles_post_ra>
// kernel: transform_block.1
= control target key start
LH: loop header
LB: loop body
LE: loop exit
PB: predicated region body
PF: predicated region fallthrough
CT: control target
= control target key end

     0   :  { %s3243_s21 = smov 0   ;;  %s3792_s0 = inlined_call_operand.vmem [shape: f32[2,4,256], index: 0, kind: input, shape index: {}]   ;;  %s3793_s1 = inlined_call_operand.vmem [shape: f32[9,256], index: 1, kind: input, shape index: {}]   ;;  %s3794_s2 = inlined_call_operand.vmem [shape: f32[3,9,4,4], index: 2, kind: input, shape index: {}]   ;;  %s3795_s3 = inlined_call_operand.vmem [shape: f32[3,4,1], index: 3, kind: input, shape index: {}]   ;;  %s3796_s4 = inlined_call_operand.vmem [shape: f32[2,4,4], index: 4, kind: input, shape index: {}]   ;;  %s3797_s5 = inlined_call_operand.vmem [shape: f32[4,1], index: 5, kind: input, shape index: {}]   ;;  %s3798_s6 = inlined_call_operand.vmem [shape: f32[2,4,256], index: 6, kind: output, shape index: {}]  }
   0x1 LB: > { %s3038_s22 = sadd.s32 4294967295, %s3196_s21   ;;  %p3042_p0 = scmp.ge.s32.totalorder %s3196_s21, 1  ;;  %s3196_s21 = sphi %s3243_s21, %s16_s21  }
   0x2   : > { %p212_p1 = scmp.lt.s32.totalorder %s3196_s21, 3 }
   0x4   : > { %p213_p2 = pnand %p3042_p0, %p212_p1 }
   0x5   : > { %p242_p3 = scmp.lt.s32.totalorder (!%p213_p2), %s3038_s22, 1  ;;  %s3198_s27 = smov (!%p213_p2), 17  }
   0x6   : > { %216 = sbr.rel (%p213_p2) target bundleno = 1268 (0x4f4), region = 44  ;;  %s3199_s28 = smov (!%p213_p2), 16  }
   0x7   : > { %s3201_s29 = smov (!%p213_p2), 15   ;;  %s3202_s30 = smov (!%p213_p2), 1  }
   0x8   : > { %s3203_s7 = smov (!%p213_p2), 127   ;;  %s3204_s8 = smov (!%p213_p2), 113  }
   0x9   : > { %s3206_s9 = smov (!%p213_p2), 112   ;;  %s3207_s10 = smov (!%p213_p2), 111  }
   0xb   : > { %s3800_s22 = smov (!%p242_p3, %s3038_s22), 1  ;;  %v3200_v2 = vmov 0.0   ;;  %v3205_v3 = vmov 0   ;;  %v1149_v4 = vld [vmem:[%s3795_s3] sm:$0xf]  ;;  %v256_v5 = vlaneseq  ;;  %v3315_v10 = vld [vmem:[%s3793_s1 + $0x8] sm:$0xff] }
   0xc   : > { %s3167_s23 = sshll.u32 %s3800_s22, 3  ;;  %422 = vmatprep.mubr.f32.mxu0 %v3200_v2  ;;  %502 = vmatprep.mubr.f32.mxu1 %v3200_v2  ;;  %v3310_v9 = vld [vmem:[%s3793_s1] sm:$0xff]  ;;  %vm351_vm1 = vcmask 1043456   ;;  %vm347_vm5 = vcmask 31744   ;;  %v3056_v52 = vld [vmem:[%s3794_s2 + $0x8] sm:$0xf] }
   0xd   : > { %s246_s26 = scalar_lea.vmem %s3792_s0, %s3167_s23  ;;  %3187 = vset.pattern.permute.xlu0 %v3205_v3  ;;  %3188 = vset.pattern.permute.xlu1 %v3205_v3  ;;  %v3302_v6 = vshrl.u32 %v256_v5, 7  ;;  %v3305_v8 = vand.u32 127, %v256_v5  ;;  %v335_v26 = vld [vmem:[%s3794_s2] sm:$0xf]  ;;  %v3049_v40 = vld [vmem:[%s3794_s2 + $0x4] sm:$0xf] }
   0xe   : > { %v3259_v0 = vld [vmem:[%s246_s26] sm:$0xff]  ;;  %v3060_v53 = vld [vmem:[%s3794_s2 + $0xc] sm:$0xf]  ;;  %v3064_v63 = vld [vmem:[%s3794_s2 + $0x10] sm:$0xf] }
   0xf   : > { %324 = vrot.lane.b32.xlu1 %v3259_v0, %s3198_s27  ;;  %336 = vrot.lane.b32.xlu0 %v3259_v0, %s3199_s28  ;;  %v3267_v1 = vcombine.high %v3259_v0, %v3259_v0  ;;  %v258_v7 = vsub.s32 0, %v3302_v6  ;;  %vm330_vm0 = vcmp.lt.s32.totalorder %v3305_v8, 17  ;;  %v266_v15 = vsub.s32 1, %v3302_v6  ;;  %v3068_v3 = vld [vmem:[%s3794_s2 + $0x14] sm:$0xf] }
  0x10   : > { %v274_v18 = vsub.s32 2, %v3302_v6  ;;  %v282_v19 = vsub.s32 3, %v3302_v6  ;;  %vm513_vm2 = vcmp.lt.s32.totalorder %v3305_v8, 15  ;;  %vm340_vm3 = vcmp.lt.s32.totalorder %v3305_v8, 16 }
  0x11   : > { %v3318_v13 = vrot.slane %v3310_v9, %v258_v7  ;;  %v3322_v14 = vrot.slane %v3315_v10, %v258_v7  ;;  %v3336_v24 = vrot.slane %v3310_v9, %v266_v15  ;;  %v3339_v25 = vrot.slane %v3315_v10, %v266_v15 }
  0x12   : > { %vm606_vm4 = vcmp.lt.s32.totalorder %v3305_v8, 1  ;;  %v3347_v27 = vrot.slane %v3310_v9, %v274_v18  ;;  %v3350_v28 = vrot.slane %v3315_v10, %v274_v18  ;;  %v3353_v31 = vrot.slane %v3310_v9, %v282_v19 }
  0x13   : > { %509 = vrot.lane.b32.xlu0 %v3259_v0, %s3201_s29  ;;  %326 = vrot.lane.b32.xlu1 %v3267_v1, %s3198_s27  ;;  %v290_v32 = vsub.s32 5, %v3302_v6  ;;  %v3368_v39 = vrot.slane %v3315_v10, %v282_v19  ;;  %v298_v48 = vsub.s32 6, %v3302_v6  ;;  %vm781_vm6 = vcmp.lt.s32.totalorder %v3305_v8, 127 }
  0x14   : > { %v306_v59 = vsub.s32 7, %v3302_v6  ;;  %vm874_vm7 = vcmp.lt.s32.totalorder %v3305_v8, 113  ;;  %vm967_vm8 = vcmp.lt.s32.totalorder %v3305_v8, 112  ;;  %vm1060_vm9 = vcmp.lt.s32.totalorder %v3305_v8, 111 }
  0x15   : > { %v3378_v44 = vrot.slane %v3310_v9, %v290_v32  ;;  %v3392_v51 = vrot.slane %v3315_v10, %v290_v32  ;;  %v3412_v58 = vrot.slane %v3310_v9, %v298_v48  ;;  %v3420_v62 = vrot.slane %v3315_v10, %v298_v48 }
  0x17   : > { %511 = vrot.lane.b32.xlu1 %v3267_v1, %s3201_s29  ;;  %338 = vrot.lane.b32.xlu0 %v3267_v1, %s3199_s28 }
  0x1b   : > { %604 = vrot.lane.b32.xlu1 %v3267_v1, %s3202_s30  ;;  %602 = vrot.lane.b32.xlu0 %v3259_v0, %s3202_s30 }
  0x1f   : > { %779 = vrot.lane.b32.xlu1 %v3267_v1, %s3203_s7  ;;  %777 = vrot.lane.b32.xlu0 %v3259_v0, %s3203_s7 }
  0x23   : > { %872 = vrot.lane.b32.xlu1 %v3267_v1, %s3204_s8  ;;  %870 = vrot.lane.b32.xlu0 %v3259_v0, %s3204_s8 }
  0x27   : > { %965 = vrot.lane.b32.xlu1 %v3267_v1, %s3206_s9  ;;  %963 = vrot.lane.b32.xlu0 %v3259_v0, %s3206_s9 }
  0x2b   : > { %1058 = vrot.lane.b32.xlu1 %v3267_v1, %s3207_s10  ;;  %1056 = vrot.lane.b32.xlu0 %v3259_v0, %s3207_s10 }
  0x2f   : > { %1152 = vperm.xlu0 %3187, %v1149_v4  }
  0x81   : > { %v325_v11 = vpop.permute.xlu1 %324  ;;  %v337_v12 = vpop.permute.xlu0 %336 }
  0x85   : > { %v510_v16 = vpop.permute.xlu0 %509  ;;  %v327_v17 = vpop.permute.xlu1 %326 }
  0x86   : > { %v331_v20 = vsel %vm330_vm0, %v325_v11, %v327_v17  ;;  %v332_v21 = vsel %vm330_vm0, %v327_v17, %v325_v11  ;;  %v3440_v11 = vrot.slane %v3310_v9, %v306_v59  ;;  %v3072_v9 = vld [vmem:[%s3794_s2 + $0x18] sm:$0xf] }
  0x87   : > { %v333_v22 = vmul.f32 %v332_v21, %v3318_v13  ;;  %v334_v23 = vmul.f32 %v331_v20, %v3322_v14 }
  0x89   : > { %3053 = vmatprep.subr.msk.mxu1 %vm351_vm1, %v334_v23  ;;  %v512_v29 = vpop.permute.xlu1 %511  ;;  %v339_v30 = vpop.permute.xlu0 %338  ;;  %v3473_v23 = vld [vmem:[%s3793_s1 + $0x18] ss:$0 sm:$0xff] }
  0x8a   : > { %v514_v33 = vsel %vm513_vm2, %v510_v16, %v512_v29  ;;  %v341_v34 = vsel %vm340_vm3, %v337_v12, %v339_v30  ;;  %v342_v35 = vsel %vm340_vm3, %v339_v30, %v337_v12  ;;  %3054 = vmatpush1.msk.msra.mxu1 %vm351_vm1, %v333_v22  ;;  %v515_v36 = vsel %vm513_vm2, %v512_v29, %v510_v16  ;;  %v3468_v22 = vld [vmem:[%s3793_s1 + $0x10] ss:$0 sm:$0xff] }
  0x8b   : > { %v343_v37 = vmul.f32 %v342_v35, %v3336_v24  ;;  %v344_v38 = vmul.f32 %v341_v34, %v3339_v25  ;;  %3055 = vmatmul.mubr.msk.f32.vlgmr.msra.gmra.mxu1 %vm347_vm5, %v335_v26  ;;  %v517_v41 = vmul.f32 %v514_v33, %v3350_v28  ;;  %v516_v45 = vmul.f32 %v515_v36, %v3347_v27  ;;  %v3076_v26 = vld [vmem:[%s3794_s2 + $0x1c] sm:$0xf]  ;;  %v3080_v36 = vld [vmem:[%s3794_s2 + $0x20] sm:$0xf] }
  0x8c   : > { %686 = vmatprep.mubr.f32.mxu1 %v3200_v2  ;;  %v3447_v16 = vrot.slane %v3315_v10, %v306_v59 }
  0x8d   : > { %v605_v42 = vpop.permute.xlu1 %604  ;;  %3050 = vmatprep.subr.msk.mxu0 %vm351_vm1, %v344_v38  ;;  %v603_v43 = vpop.permute.xlu0 %602 }
  0x8e   : > { %v607_v46 = vsel %vm606_vm4, %v603_v43, %v605_v42  ;;  %v608_v47 = vsel %vm606_vm4, %v605_v42, %v603_v43  ;;  %3051 = vmatpush1.msk.msra.mxu0 %vm351_vm1, %v343_v37 }
  0x8f   : > { %v609_v49 = vmul.f32 %v608_v47, %v3353_v31  ;;  %v610_v50 = vmul.f32 %v607_v46, %v3368_v39  ;;  %3052 = vmatmul.mubr.msk.f32.vlgmr.msra.gmra.mxu0 %vm347_vm5, %v3049_v40  ;;  %3057 = vmatprep.subr.msk.mxu0 %vm351_vm1, %v517_v41 }
  0x90   : > { %3058 = vmatpush1.msk.msra.mxu0 %vm351_vm1, %v516_v45  ;;  %593 = vmatprep.mubr.f32.mxu0 %v3200_v2 }
  0x91   : > { %v780_v54 = vpop.permute.xlu1 %779  ;;  %3061 = vmatprep.subr.msk.mxu1 %vm351_vm1, %v610_v50  ;;  %v778_v55 = vpop.permute.xlu0 %777  ;;  %3065 = vmatprep.subr.msk.mxu0 %vm351_vm1, %v3267_v1 }
  0x92   : > { %v782_v56 = vsel %vm781_vm6, %v778_v55, %v780_v54  ;;  %v783_v57 = vsel %vm781_vm6, %v780_v54, %v778_v55  ;;  %3062 = vmatpush1.msk.msra.mxu1 %vm351_vm1, %v609_v49 }
  0x93   : > { %v784_v60 = vmul.f32 %v782_v56, %v3378_v44  ;;  %v785_v61 = vmul.f32 %v783_v57, %v3392_v51  ;;  %3059 = vmatmul.mubr.msk.f32.vlgmr.msra.gmra.mxu0 %vm347_vm5, %v3056_v52  ;;  %3063 = vmatmul.mubr.msk.f32.vlgmr.msra.gmra.mxu1 %vm347_vm5, %v3060_v53 }
  0x94   : > { %3066 = vmatpush1.msk.msra.mxu0 %vm351_vm1, %v3259_v0  ;;  %768 = vmatprep.mubr.f32.mxu0 %v3200_v2 }
  0x95   : > { %v873_v4 = vpop.permute.xlu1 %872  ;;  %3069 = vmatprep.subr.msk.mxu1 %vm351_vm1, %v785_v61  ;;  %v871_v5 = vpop.permute.xlu0 %870  ;;  %861 = vmatprep.mubr.f32.mxu1 %v3200_v2 }
  0x96   : > { %v875_v6 = vsel %vm874_vm7, %v871_v5, %v873_v4  ;;  %v876_v7 = vsel %vm874_vm7, %v873_v4, %v871_v5  ;;  %3070 = vmatpush1.msk.msra.mxu1 %vm351_vm1, %v784_v60 }
  0x97   : > { %v877_v12 = vmul.f32 %v875_v6, %v3412_v58  ;;  %v878_v15 = vmul.f32 %v876_v7, %v3420_v62  ;;  %3067 = vmatmul.mubr.msk.f32.vlgmr.msra.gmra.mxu0 %vm347_vm5, %v3064_v63  ;;  %3071 = vmatmul.mubr.msk.f32.vlgmr.msra.gmra.mxu1 %vm347_vm5, %v3068_v3 }
  0x98   : > { %954 = vmatprep.mubr.f32.mxu0 %v3200_v2  ;;  %1047 = vmatprep.mubr.f32.mxu1 %v3200_v2 }
  0x99   : > { %v966_v17 = vpop.permute.xlu1 %965  ;;  %3073 = vmatprep.subr.msk.mxu0 %vm351_vm1, %v878_v15  ;;  %v964_v18 = vpop.permute.xlu0 %963 }
  0x9a   : > { %v968_v19 = vsel %vm967_vm8, %v964_v18, %v966_v17  ;;  %v969_v10 = vsel %vm967_vm8, %v966_v17, %v964_v18  ;;  %3074 = vmatpush1.msk.msra.mxu0 %vm351_vm1, %v877_v12 }
  0x9b   : > { %v970_v20 = vmul.f32 %v968_v19, %v3440_v11  ;;  %v971_v21 = vmul.f32 %v969_v10, %v3447_v16  ;;  %3075 = vmatmul.mubr.msk.f32.vlgmr.msra.gmra.mxu0 %vm347_vm5, %v3072_v9 }
  0x9c   : > { %1140 = vmatprep.mubr.f32.mxu0 %v3200_v2 }
  0x9d   : > { %v1059_v29 = vpop.permute.xlu1 %1058  ;;  %3077 = vmatprep.subr.msk.mxu1 %vm351_vm1, %v971_v21  ;;  %v1057_v30 = vpop.permute.xlu0 %1056 }
  0x9e   : > { %v1061_v32 = vsel %vm1060_vm9, %v1057_v30, %v1059_v29  ;;  %v1062_v33 = vsel %vm1060_vm9, %v1059_v29, %v1057_v30  ;;  %3078 = vmatpush1.msk.msra.mxu1 %vm351_vm1, %v970_v20 }
  0x9f   : > { %v1063_v34 = vmul.f32 %v3468_v22, %v1061_v32  ;;  %v1064_v35 = vmul.f32 %v3473_v23, %v1062_v33  ;;  %3079 = vmatmul.mubr.msk.f32.vlgmr.msra.gmra.mxu1 %vm347_vm5, %v3076_v26  ;;  %v3120_v32 = vld [vmem:[%s3795_s3 + $0x4] sm:$0xf] }
  0xa0   : > { %1252 = vmatprep.mubr.f32.mxu1 %v3200_v2 }
  0xa1   : > { %3081 = vmatprep.subr.msk.mxu0 %vm351_vm1, %v1064_v35 }
  0xa2   : > { %3082 = vmatpush1.msk.msra.mxu0 %vm351_vm1, %v1063_v34 }
  0xa3   : > { %3083 = vmatmul.mubr.msk.f32.vlgmr.msra.gmra.mxu0 %vm347_vm5, %v3080_v36 }
  0xa4   : > { %1332 = vmatprep.mubr.f32.mxu0 %v3200_v2 }
  0xaa   : > { %v1153_v17 = vpop.permute.xlu0 %1152 }
 0x14b   : > { %v504_v37 = vpop.f32.mrf.mxu1 }
 0x14d   : > { %v506_v40 = vpop.f32.mrf.mxu1 }
 0x14f   : > { %v424_v38 = vpop.f32.mrf.mxu0 }
 0x150   : > { %v505_v41 = vadd.f32 %v504_v37, %v424_v38 }
 0x151   : > { %v426_v42 = vpop.f32.mrf.mxu0 }
 0x152   : > { %v507_v43 = vadd.f32 %v506_v40, %v426_v42  ;;  %v3085_v42 = vld [vmem:[%s3794_s2 + $0x28] sm:$0xf] }
 0x153   : > { %v595_v45 = vpop.f32.mrf.mxu0  ;;  %v688_v46 = vpop.f32.mrf.mxu1 }
 0x154   : > { %v600_v47 = vadd.f32 %v595_v45, %v505_v41 }
 0x155   : > { %v597_v48 = vpop.f32.mrf.mxu0  ;;  %v690_v49 = vpop.f32.mrf.mxu1 }
 0x156   : > { %v601_v50 = vadd.f32 %v597_v48, %v507_v43  ;;  %v693_v52 = vadd.f32 %v688_v46, %v600_v47 }
 0x157   : > { %v770_v53 = vpop.f32.mrf.mxu0  ;;  %v863_v54 = vpop.f32.mrf.mxu1 }
 0x158   : > { %v694_v55 = vadd.f32 %v690_v49, %v601_v50  ;;  %v775_v56 = vadd.f32 %v770_v53, %v693_v52  ;;  %v3084_v50 = vld [vmem:[%s3794_s2 + $0x24] sm:$0xf] }
 0x159   : > { %v772_v57 = vpop.f32.mrf.mxu0  ;;  %v865_v61 = vpop.f32.mrf.mxu1 }
 0x15a   : > { %v776_v59 = vadd.f32 %v772_v57, %v694_v55  ;;  %v868_v60 = vadd.f32 %v863_v54, %v775_v56 }
 0x15b   : > { %v956_v63 = vpop.f32.mrf.mxu0 }
 0x15c   : > { %v869_v3 = vadd.f32 %v865_v61, %v776_v59  ;;  %v961_v4 = vadd.f32 %v956_v63, %v868_v60  ;;  %v3092_v59 = vld [vmem:[%s3794_s2 + $0x2c] sm:$0xf] }
 0x15d   : > { %v958_v5 = vpop.f32.mrf.mxu0 }
 0x15e   : > { %v962_v12 = vadd.f32 %v958_v5, %v869_v3  ;;  %v3096_v5 = vld [vmem:[%s3794_s2 + $0x30] sm:$0xf] }
 0x15f   : > { %v1049_v6 = vpop.f32.mrf.mxu1 }
 0x160   : > { %v1054_v15 = vadd.f32 %v1049_v6, %v961_v4  ;;  %v3100_v6 = vld [vmem:[%s3794_s2 + $0x34] sm:$0xf] }
 0x161   : > { %v1051_v7 = vpop.f32.mrf.mxu1 }
 0x162   : > { %v1055_v18 = vadd.f32 %v1051_v7, %v962_v12 }
 0x163   : > { %v1142_v9 = vpop.f32.mrf.mxu0 }
 0x164   : > { %v1147_v19 = vadd.f32 %v1142_v9, %v1054_v15 }
 0x165   : > { %v1144_v10 = vpop.f32.mrf.mxu0 }
 0x166   : > { %v1148_v20 = vadd.f32 %v1144_v10, %v1055_v18  ;;  %v1155_v21 = vadd.f32 %v1153_v17, %v1147_v19  ;;  %v3104_v19 = vld [vmem:[%s3794_s2 + $0x38] sm:$0xf] }
 0x168   : > { %v1156_v26 = vadd.f32 %v1153_v17, %v1148_v20  ;;  %v1157_v29 = vmax.f32 %v1155_v21, 0.0 }
 0x16a   : > { %1159 = vrot.lane.b32.xlu0 %v1157_v29, %s3198_s27  ;;  %1169 = vrot.lane.b32.xlu1 %v1157_v29, %s3199_s28  ;;  %v1158_v30 = vmax.f32 %v1156_v26, 0.0 }
 0x16e   : > { %1339 = vrot.lane.b32.xlu0 %v1157_v29, %s3201_s29  ;;  %1171 = vrot.lane.b32.xlu1 %v1158_v30, %s3199_s28 }
 0x172   : > { %1431 = vrot.lane.b32.xlu0 %v1157_v29, %s3202_s30  ;;  %1161 = vrot.lane.b32.xlu1 %v1158_v30, %s3198_s27 }
 0x176   : > { %1607 = vrot.lane.b32.xlu0 %v1157_v29, %s3203_s7  ;;  %1341 = vrot.lane.b32.xlu1 %v1158_v30, %s3201_s29 }
 0x17a   : > { %1699 = vrot.lane.b32.xlu0 %v1157_v29, %s3204_s8  ;;  %1433 = vrot.lane.b32.xlu1 %v1158_v30, %s3202_s30 }
 0x17e   : > { %1791 = vrot.lane.b32.xlu0 %v1157_v29, %s3206_s9  ;;  %1609 = vrot.lane.b32.xlu1 %v1158_v30, %s3203_s7 }
 0x182   : > { %1883 = vrot.lane.b32.xlu0 %v1157_v29, %s3207_s10  ;;  %1701 = vrot.lane.b32.xlu1 %v1158_v30, %s3204_s8 }
 0x186   : > { %1979 = vperm.xlu0 %3187, %v3120_v32   ;;  %1793 = vrot.lane.b32.xlu1 %v1158_v30, %s3206_s9  ;;  %v3108_v32 = vld [vmem:[%s3794_s2 + $0x3c] sm:$0xf] }
 0x18a   : > { %1885 = vrot.lane.b32.xlu1 %v1158_v30, %s3207_s10 }
 0x1dc   : > { %v1160_v33 = vpop.permute.xlu0 %1159  ;;  %v1170_v34 = vpop.permute.xlu1 %1169 }
 0x1e0   : > { %v1340_v35 = vpop.permute.xlu0 %1339  ;;  %v1172_v36 = vpop.permute.xlu1 %1171 }
 0x1e1   : > { %v1173_v37 = vsel %vm340_vm3, %v1170_v34, %v1172_v36  ;;  %v1174_v38 = vsel %vm340_vm3, %v1172_v36, %v1170_v34 }
 0x1e2   : > { %v1175_v40 = vmul.f32 %v1174_v38, %v3336_v24  ;;  %v1176_v41 = vmul.f32 %v1173_v37, %v3339_v25  ;;  %v3112_v38 = vld [vmem:[%s3794_s2 + $0x40] sm:$0xf] }
 0x1e4   : > { %v1432_v43 = vpop.permute.xlu0 %1431  ;;  %3086 = vmatprep.subr.msk.mxu1 %vm351_vm1, %v1176_v41  ;;  %v1162_v45 = vpop.permute.xlu1 %1161 }
 0x1e5   : > { %v1163_v46 = vsel %vm330_vm0, %v1160_v33, %v1162_v45  ;;  %v1164_v47 = vsel %vm330_vm0, %v1162_v45, %v1160_v33  ;;  %3087 = vmatpush1.msk.msra.mxu1 %vm351_vm1, %v1175_v40 }
 0x1e6   : > { %v1165_v48 = vmul.f32 %v1164_v47, %v3318_v13  ;;  %v1166_v49 = vmul.f32 %v1163_v46, %v3322_v14  ;;  %3088 = vmatmul.mubr.msk.f32.vlgmr.msra.gmra.mxu1 %vm347_vm5, %v3085_v42  ;;  %v3116_v47 = vld [vmem:[%s3794_s2 + $0x44] sm:$0xf] }
 0x1e7   : > { %1422 = vmatprep.mubr.f32.mxu1 %v3200_v2 }
 0x1e8   : > { %3089 = vmatprep.subr.msk.mxu0 %vm351_vm1, %v1166_v49  ;;  %v1342_v52 = vpop.permute.xlu1 %1341  ;;  %v1608_v55 = vpop.permute.xlu0 %1607 }
 0x1e9   : > { %v1343_v53 = vsel %vm513_vm2, %v1340_v35, %v1342_v52  ;;  %v1344_v54 = vsel %vm513_vm2, %v1342_v52, %v1340_v35  ;;  %3090 = vmatpush1.msk.msra.mxu0 %vm351_vm1, %v1165_v48 }
 0x1ea   : > { %v1345_v56 = vmul.f32 %v1344_v54, %v3347_v27  ;;  %v1346_v57 = vmul.f32 %v1343_v53, %v3350_v28  ;;  %3091 = vmatmul.mubr.msk.f32.vlgmr.msra.gmra.mxu0 %vm347_vm5, %v3084_v50 }
 0x1eb   : > { %1514 = vmatprep.mubr.f32.mxu0 %v3200_v2 }
 0x1ec   : > { %3093 = vmatprep.subr.msk.mxu1 %vm351_vm1, %v1346_v57  ;;  %v1434_v60 = vpop.permute.xlu1 %1433  ;;  %v1700_v7 = vpop.permute.xlu0 %1699 }
 0x1ed   : > { %v1435_v61 = vsel %vm606_vm4, %v1432_v43, %v1434_v60  ;;  %v1436_v63 = vsel %vm606_vm4, %v1434_v60, %v1432_v43  ;;  %3094 = vmatpush1.msk.msra.mxu1 %vm351_vm1, %v1345_v56 }
 0x1ee   : > { %v1437_v3 = vmul.f32 %v1436_v63, %v3353_v31  ;;  %v1438_v4 = vmul.f32 %v1435_v61, %v3368_v39  ;;  %3101 = vmatprep.subr.msk.mxu1 %vm351_vm1, %v1158_v30  ;;  %3095 = vmatmul.mubr.msk.f32.vlgmr.msra.gmra.mxu1 %vm347_vm5, %v3092_v59 }
 0x1ef   : > { %3102 = vmatpush1.msk.msra.mxu1 %vm351_vm1, %v1157_v29  ;;  %1598 = vmatprep.mubr.f32.mxu1 %v3200_v2 }
 0x1f0   : > { %3097 = vmatprep.subr.msk.mxu0 %vm351_vm1, %v1438_v4  ;;  %v1610_v12 = vpop.permute.xlu1 %1609  ;;  %v1792_v26 = vpop.permute.xlu0 %1791 }
 0x1f1   : > { %v1611_v15 = vsel %vm781_vm6, %v1608_v55, %v1610_v12  ;;  %v1612_v9 = vsel %vm781_vm6, %v1610_v12, %v1608_v55  ;;  %3098 = vmatpush1.msk.msra.mxu0 %vm351_vm1, %v1437_v3 }
 0x1f2   : > { %v1613_v17 = vmul.f32 %v1611_v15, %v3378_v44  ;;  %v1614_v18 = vmul.f32 %v1612_v9, %v3392_v51  ;;  %3099 = vmatmul.mubr.msk.f32.vlgmr.msra.gmra.mxu0 %vm347_vm5, %v3096_v5  ;;  %3103 = vmatmul.mubr.msk.f32.vlgmr.msra.gmra.mxu1 %vm347_vm5, %v3100_v6 }
 0x1f3   : > { %1690 = vmatprep.mubr.f32.mxu0 %v3200_v2  ;;  %1782 = vmatprep.mubr.f32.mxu1 %v3200_v2 }
 0x1f4   : > { %3105 = vmatprep.subr.msk.mxu0 %vm351_vm1, %v1614_v18  ;;  %v1702_v10 = vpop.permute.xlu1 %1701  ;;  %v1884_v40 = vpop.permute.xlu0 %1883 }
 0x1f5   : > { %v1703_v20 = vsel %vm874_vm7, %v1700_v7, %v1702_v10  ;;  %v1704_v21 = vsel %vm874_vm7, %v1702_v10, %v1700_v7  ;;  %3106 = vmatpush1.msk.msra.mxu0 %vm351_vm1, %v1613_v17 }
 0x1f6   : > { %v1705_v29 = vmul.f32 %v1703_v20, %v3412_v58  ;;  %v1706_v30 = vmul.f32 %v1704_v21, %v3420_v62  ;;  %3107 = vmatmul.mubr.msk.f32.vlgmr.msra.gmra.mxu0 %vm347_vm5, %v3104_v19 }
 0x1f7   : > { %1874 = vmatprep.mubr.f32.mxu0 %v3200_v2 }
 0x1f8   : > { %3109 = vmatprep.subr.msk.mxu1 %vm351_vm1, %v1706_v30  ;;  %v1794_v33 = vpop.permute.xlu1 %1793 }
 0x1f9   : > { %v1795_v34 = vsel %vm967_vm8, %v1792_v26, %v1794_v33  ;;  %v1796_v35 = vsel %vm967_vm8, %v1794_v33, %v1792_v26  ;;  %3110 = vmatpush1.msk.msra.mxu1 %vm351_vm1, %v1705_v29 }
 0x1fa   : > { %v1797_v36 = vmul.f32 %v1795_v34, %v3440_v11  ;;  %v1798_v37 = vmul.f32 %v1796_v35, %v3447_v16  ;;  %3111 = vmatmul.mubr.msk.f32.vlgmr.msra.gmra.mxu1 %vm347_vm5, %v3108_v32 }
 0x1fb   : > { %1966 = vmatprep.mubr.f32.mxu1 %v3200_v2 }
 0x1fc   : > { %3113 = vmatprep.subr.msk.mxu0 %vm351_vm1, %v1798_v37  ;;  %v1886_v41 = vpop.permute.xlu1 %1885 }
 0x1fd   : > { %v1887_v42 = vsel %vm1060_vm9, %v1884_v40, %v1886_v41  ;;  %v1888_v43 = vsel %vm1060_vm9, %v1886_v41, %v1884_v40  ;;  %3114 = vmatpush1.msk.msra.mxu0 %vm351_vm1, %v1797_v36 }
 0x1fe   : > { %v1889_v45 = vmul.f32 %v3468_v22, %v1887_v42  ;;  %v1890_v46 = vmul.f32 %v3473_v23, %v1888_v43  ;;  %3115 = vmatmul.mubr.msk.f32.vlgmr.msra.gmra.mxu0 %vm347_vm5, %v3112_v38  ;;  %v3157_v42 = vld [vmem:[%s3795_s3 + $0x8] sm:$0xf]  ;;  %v2970_v43 = vld [vmem:[%s3797_s5] sm:$0xf] }
 0x1ff   : > { %2079 = vmatprep.mubr.f32.mxu0 %v3200_v2 }
 0x200   : > { %3117 = vmatprep.subr.msk.mxu1 %vm351_vm1, %v1890_v46 }
 0x201   : > { %3118 = vmatpush1.msk.msra.mxu1 %vm351_vm1, %v1889_v45  ;;  %v1980_v34 = vpop.permute.xlu0 %1979 }
 0x202   : > { %3119 = vmatmul.mubr.msk.f32.vlgmr.msra.gmra.mxu1 %vm347_vm5, %v3116_v47 }
 0x203   : > { %2159 = vmatprep.mubr.f32.mxu1 %v3200_v2 }
 0x2a6   : > { %v1254_v48 = vpop.f32.mrf.mxu1 }
 0x2a8   : > { %v1256_v49 = vpop.f32.mrf.mxu1 }
 0x2aa   : > { %v1334_v50 = vpop.f32.mrf.mxu0 }
 0x2ab   : > { %v1335_v52 = vadd.f32 %v1334_v50, %v1254_v48 }
 0x2ac   : > { %v1336_v53 = vpop.f32.mrf.mxu0 }
 0x2ad   : > { %v1337_v54 = vadd.f32 %v1336_v53, %v1256_v49  ;;  %v3122_v53 = vld [vmem:[%s3794_s2 + $0x4c] sm:$0xf] }
 0x2ae   : > { %v1424_v55 = vpop.f32.mrf.mxu1 }
 0x2af   : > { %v1429_v56 = vadd.f32 %v1424_v55, %v1335_v52 }
 0x2b0   : > { %v1426_v57 = vpop.f32.mrf.mxu1 }
 0x2b1   : > { %v1430_v59 = vadd.f32 %v1426_v57, %v1337_v54 }
 0x2b2   : > { %v1516_v60 = vpop.f32.mrf.mxu0  ;;  %v1600_v61 = vpop.f32.mrf.mxu1 }
 0x2b3   : > { %v1521_v63 = vadd.f32 %v1516_v60, %v1429_v56 }
 0x2b4   : > { %v1518_v3 = vpop.f32.mrf.mxu0  ;;  %v1602_v6 = vpop.f32.mrf.mxu1 }
 0x2b5   : > { %v1522_v4 = vadd.f32 %v1518_v3, %v1430_v59  ;;  %v1605_v5 = vadd.f32 %v1600_v61, %v1521_v63  ;;  %v3121_v59 = vld [vmem:[%s3794_s2 + $0x48] sm:$0xf] }
 0x2b6   : > { %v1692_v7 = vpop.f32.mrf.mxu0 }
 0x2b7   : > { %v1606_v12 = vadd.f32 %v1602_v6, %v1522_v4  ;;  %v1697_v15 = vadd.f32 %v1692_v7, %v1605_v5  ;;  %v3129_v4 = vld [vmem:[%s3794_s2 + $0x50] sm:$0xf] }
 0x2b8   : > { %v1694_v9 = vpop.f32.mrf.mxu0 }
 0x2b9   : > { %v1698_v18 = vadd.f32 %v1694_v9, %v1606_v12 }
 0x2ba   : > { %v1784_v17 = vpop.f32.mrf.mxu1 }
 0x2bb   : > { %v1789_v19 = vadd.f32 %v1784_v17, %v1697_v15  ;;  %v3133_v15 = vld [vmem:[%s3794_s2 + $0x54] sm:$0xf] }
 0x2bc   : > { %v1786_v10 = vpop.f32.mrf.mxu1 }
 0x2bd   : > { %v1790_v26 = vadd.f32 %v1786_v10, %v1698_v18 }
 0x2be   : > { %v1876_v20 = vpop.f32.mrf.mxu0 }
 0x2bf   : > { %v1881_v29 = vadd.f32 %v1876_v20, %v1789_v19  ;;  %v3141_v20 = vld [vmem:[%s3794_s2 + $0x5c] sm:$0xf] }
 0x2c0   : > { %v1878_v21 = vpop.f32.mrf.mxu0 }
 0x2c1   : > { %v1882_v32 = vadd.f32 %v1878_v21, %v1790_v26 }
 0x2c2   : > { %v1968_v30 = vpop.f32.mrf.mxu1 }
 0x2c3   : > { %v1973_v33 = vadd.f32 %v1968_v30, %v1881_v29 }
 0x2c4   : > { %v1970_v35 = vpop.f32.mrf.mxu1 }
 0x2c5   : > { %v1982_v36 = vadd.f32 %v1980_v34, %v1973_v33  ;;  %v1974_v37 = vadd.f32 %v1970_v35, %v1882_v32  ;;  %v3145_v32 = vld [vmem:[%s3794_s2 + $0x60] sm:$0xf] }
 0x2c7   : > { %v3626_v38 = vmax.f32 %v1982_v36, 0.0  ;;  %v1983_v40 = vadd.f32 %v1980_v34, %v1974_v37  ;;  %v3149_v36 = vld [vmem:[%s3794_s2 + $0x64] sm:$0xf] }
 0x2c9   : > { %v1985_v41 = vmax.f32 %v1983_v40, 0.0  ;;  %1996 = vrot.lane.b32.xlu1 %v3626_v38, %s3199_s28 }
 0x2cb   : > { %1998 = vrot.lane.b32.xlu0 %v1985_v41, %s3199_s28 }
 0x2cd   : > { %1986 = vrot.lane.b32.xlu1 %v3626_v38, %s3198_s27 }
 0x2cf   : > { %1988 = vrot.lane.b32.xlu0 %v1985_v41, %s3198_s27 }
 0x2d1   : > { %2166 = vrot.lane.b32.xlu1 %v3626_v38, %s3201_s29 }
 0x2d3   : > { %2168 = vrot.lane.b32.xlu0 %v1985_v41, %s3201_s29 }
 0x2d5   : > { %2258 = vrot.lane.b32.xlu1 %v3626_v38, %s3202_s30 }
 0x2d7   : > { %2260 = vrot.lane.b32.xlu0 %v1985_v41, %s3202_s30 }
 0x2d9   : > { %2434 = vrot.lane.b32.xlu1 %v3626_v38, %s3203_s7 }
 0x2db   : > { %2436 = vrot.lane.b32.xlu0 %v1985_v41, %s3203_s7 }
 0x2dd   : > { %2526 = vrot.lane.b32.xlu1 %v3626_v38, %s3204_s8 }
 0x2df   : > { %2528 = vrot.lane.b32.xlu0 %v1985_v41, %s3204_s8 }
 0x2e1   : > { %2618 = vrot.lane.b32.xlu1 %v3626_v38, %s3206_s9 }
 0x2e3   : > { %2620 = vrot.lane.b32.xlu0 %v1985_v41, %s3206_s9 }
 0x2e5   : > { %2710 = vrot.lane.b32.xlu1 %v3626_v38, %s3207_s10 }
 0x2e7   : > { %2712 = vrot.lane.b32.xlu0 %v1985_v41, %s3207_s10  ;;  %s251_s10 = scalar_lea.vmem %s3798_s6, %s3167_s23 }
 0x2e9   : > { %2806 = vperm.xlu1 %3188, %v3157_v42   ;;  %v3153_v42 = vld [vmem:[%s3794_s2 + $0x68] sm:$0xf] }
 0x2eb   : > { %2973 = vperm.xlu0 %3187, %v2970_v43  }
 0x33b   : > { %v1997_v45 = vpop.permute.xlu1 %1996 }
 0x33d   : > { %v1999_v46 = vpop.permute.xlu0 %1998 }
 0x33e   : > { %v2000_v47 = vsel %vm340_vm3, %v1997_v45, %v1999_v46  ;;  %v2001_v48 = vsel %vm340_vm3, %v1999_v46, %v1997_v45 }
 0x33f   : > { %v2002_v49 = vmul.f32 %v2001_v48, %v3336_v24  ;;  %v2003_v50 = vmul.f32 %v2000_v47, %v3339_v25  ;;  %v1987_v52 = vpop.permute.xlu1 %1986 }
 0x341   : > { %3123 = vmatprep.subr.msk.mxu0 %vm351_vm1, %v2003_v50  ;;  %v1989_v54 = vpop.permute.xlu0 %1988 }
 0x342   : > { %v1990_v55 = vsel %vm330_vm0, %v1987_v52, %v1989_v54  ;;  %v1991_v56 = vsel %vm330_vm0, %v1989_v54, %v1987_v52  ;;  %3124 = vmatpush1.msk.msra.mxu0 %vm351_vm1, %v2002_v49 }
 0x343   : > { %v1992_v24 = vmul.f32 %v1991_v56, %v3318_v13  ;;  %v1993_v25 = vmul.f32 %v1990_v55, %v3322_v14  ;;  %v2167_v57 = vpop.permute.xlu1 %2166  ;;  %3125 = vmatmul.mubr.msk.f32.vlgmr.msra.gmra.mxu0 %vm347_vm5, %v3122_v53 }
 0x344   : > { %2249 = vmatprep.mubr.f32.mxu0 %v3200_v2 }
 0x345   : > { %3126 = vmatprep.subr.msk.mxu1 %vm351_vm1, %v1993_v25  ;;  %v2169_v60 = vpop.permute.xlu0 %2168 }
 0x346   : > { %v2170_v61 = vsel %vm513_vm2, %v2167_v57, %v2169_v60  ;;  %v2171_v13 = vsel %vm513_vm2, %v2169_v60, %v2167_v57  ;;  %3127 = vmatpush1.msk.msra.mxu1 %vm351_vm1, %v1992_v24 }
 0x347   : > { %v2172_v14 = vmul.f32 %v2171_v13, %v3347_v27  ;;  %v2173_v63 = vmul.f32 %v2170_v61, %v3350_v28  ;;  %v2259_v3 = vpop.permute.xlu1 %2258  ;;  %3128 = vmatmul.mubr.msk.f32.vlgmr.msra.gmra.mxu1 %vm347_vm5, %v3121_v59 }
 0x348   : > { %2341 = vmatprep.mubr.f32.mxu1 %v3200_v2 }
 0x349   : > { %3130 = vmatprep.subr.msk.mxu0 %vm351_vm1, %v2173_v63  ;;  %v2261_v5 = vpop.permute.xlu0 %2260 }
 0x34a   : > { %v2262_v6 = vsel %vm606_vm4, %v2259_v3, %v2261_v5  ;;  %v2263_v27 = vsel %vm606_vm4, %v2261_v5, %v2259_v3  ;;  %3131 = vmatpush1.msk.msra.mxu0 %vm351_vm1, %v2172_v14 }
 0x34b   : > { %v2264_v28 = vmul.f32 %v2263_v27, %v3353_v31  ;;  %v2265_v7 = vmul.f32 %v2262_v6, %v3368_v39  ;;  %v2435_v12 = vpop.permute.xlu1 %2434  ;;  %3138 = vmatprep.subr.msk.mxu0 %vm351_vm1, %v1985_v41  ;;  %3132 = vmatmul.mubr.msk.f32.vlgmr.msra.gmra.mxu0 %vm347_vm5, %v3129_v4  ;;  %v3137_v31 = vld [vmem:[%s3794_s2 + $0x58] sm:$0xf] }
 0x34c   : > { %3139 = vmatpush1.msk.msra.mxu0 %vm351_vm1, %v3626_v38  ;;  %2425 = vmatprep.mubr.f32.mxu0 %v3200_v2 }
 0x34d   : > { %3134 = vmatprep.subr.msk.mxu1 %vm351_vm1, %v2265_v7  ;;  %v2437_v39 = vpop.permute.xlu0 %2436 }
 0x34e   : > { %v2438_v9 = vsel %vm781_vm6, %v2435_v12, %v2437_v39  ;;  %v2439_v17 = vsel %vm781_vm6, %v2437_v39, %v2435_v12  ;;  %3135 = vmatpush1.msk.msra.mxu1 %vm351_vm1, %v2264_v28 }
 0x34f   : > { %v2440_v18 = vmul.f32 %v2438_v9, %v3378_v44  ;;  %v2441_v19 = vmul.f32 %v2439_v17, %v3392_v51  ;;  %v2527_v10 = vpop.permute.xlu1 %2526  ;;  %3136 = vmatmul.mubr.msk.f32.vlgmr.msra.gmra.mxu1 %vm347_vm5, %v3133_v15  ;;  %3140 = vmatmul.mubr.msk.f32.vlgmr.msra.gmra.mxu0 %vm347_vm5, %v3137_v31 }
 0x350   : > { %2517 = vmatprep.mubr.f32.mxu1 %v3200_v2  ;;  %2609 = vmatprep.mubr.f32.mxu0 %v3200_v2 }
 0x351   : > { %3142 = vmatprep.subr.msk.mxu1 %vm351_vm1, %v2441_v19  ;;  %v2529_v21 = vpop.permute.xlu0 %2528 }
 0x352   : > { %v2530_v44 = vsel %vm874_vm7, %v2527_v10, %v2529_v21  ;;  %v2531_v51 = vsel %vm874_vm7, %v2529_v21, %v2527_v10  ;;  %3143 = vmatpush1.msk.msra.mxu1 %vm351_vm1, %v2440_v18  ;;  %v2813_v18 = vld [vmem:[%s3796_s4] sm:$0xf] }
 0x353   : > { %v2532_v26 = vmul.f32 %v2530_v44, %v3412_v58  ;;  %v2533_v29 = vmul.f32 %v2531_v51, %v3420_v62  ;;  %v2619_v30 = vpop.permute.xlu1 %2618  ;;  %3144 = vmatmul.mubr.msk.f32.vlgmr.msra.gmra.mxu1 %vm347_vm5, %v3141_v20 }
 0x354   : > { %2701 = vmatprep.mubr.f32.mxu1 %v3200_v2 }
 0x355   : > { %3146 = vmatprep.subr.msk.mxu0 %vm351_vm1, %v2533_v29  ;;  %v2621_v33 = vpop.permute.xlu0 %2620 }
 0x356   : > { %v2622_v34 = vsel %vm967_vm8, %v2619_v30, %v2621_v33  ;;  %v2623_v58 = vsel %vm967_vm8, %v2621_v33, %v2619_v30  ;;  %3147 = vmatpush1.msk.msra.mxu0 %vm351_vm1, %v2532_v26 }
 0x357   : > { %v2624_v62 = vmul.f32 %v2622_v34, %v3440_v11  ;;  %v2625_v35 = vmul.f32 %v2623_v58, %v3447_v16  ;;  %3148 = vmatmul.mubr.msk.f32.vlgmr.msra.gmra.mxu0 %vm347_vm5, %v3145_v32  ;;  %v2711_v37 = vpop.permute.xlu1 %2710 }
 0x358   : > { %2793 = vmatprep.mubr.f32.mxu0 %v3200_v2 }
 0x359   : > { %3150 = vmatprep.subr.msk.mxu1 %vm351_vm1, %v2625_v35  ;;  %v2713_v38 = vpop.permute.xlu0 %2712 }
 0x35a   : > { %v2714_v40 = vsel %vm1060_vm9, %v2711_v37, %v2713_v38  ;;  %v2715_v11 = vsel %vm1060_vm9, %v2713_v38, %v2711_v37  ;;  %3151 = vmatpush1.msk.msra.mxu1 %vm351_vm1, %v2624_v62 }
 0x35b   : > { %v2716_v16 = vmul.f32 %v3468_v22, %v2714_v40  ;;  %v2717_v41 = vmul.f32 %v3473_v23, %v2715_v11  ;;  %3152 = vmatmul.mubr.msk.f32.vlgmr.msra.gmra.mxu1 %vm347_vm5, %v3149_v36  ;;  %3159 = vmatprep.subr.msk.mxu1 %vm351_vm1, %v3267_v1  ;;  %v3158_v1 = vld [vmem:[%s3796_s4 + $0x4] sm:$0xf] }
 0x35c   : > { %3160 = vmatpush1.msk.msra.mxu1 %vm351_vm1, %v3259_v0  ;;  %2883 = vmatprep.mubr.f32.mxu1 %v3200_v2 }
 0x35d   : > { %3154 = vmatprep.subr.msk.mxu0 %vm351_vm1, %v2717_v41 }
 0x35e   : > { %3155 = vmatpush1.msk.msra.mxu0 %vm351_vm1, %v2716_v16 }
 0x35f   : > { %3156 = vmatmul.mubr.msk.f32.vlgmr.msra.gmra.mxu0 %vm347_vm5, %v3153_v42  ;;  %3161 = vmatmul.mubr.msk.f32.vlgmr.msra.gmra.mxu1 %vm347_vm5, %v3158_v1 }
 0x360   : > { %2963 = vmatprep.mubr.f32.mxu0 %v3200_v2 }
 0x364   : > { %v2807_v7 = vpop.permute.xlu1 %2806 }
 0x366   : > { %v2974_v26 = vpop.permute.xlu0 %2973 }
 0x403   : > { %v2081_v8 = vpop.f32.mrf.mxu0 }
 0x405   : > { %v2083_v22 = vpop.f32.mrf.mxu0 }
 0x407   : > { %v2161_v23 = vpop.f32.mrf.mxu1 }
 0x408   : > { %v2162_v0 = vadd.f32 %v2161_v23, %v2081_v8 }
 0x409   : > { %v2163_v43 = vpop.f32.mrf.mxu1 }
 0x40a   : > { %v2164_v45 = vadd.f32 %v2163_v43, %v2083_v22 }
 0x40b   : > { %v2251_v46 = vpop.f32.mrf.mxu0 }
 0x40c   : > { %v2256_v47 = vadd.f32 %v2251_v46, %v2162_v0 }
 0x40d   : > { %v2253_v48 = vpop.f32.mrf.mxu0 }
 0x40e   : > { %v2257_v49 = vadd.f32 %v2253_v48, %v2164_v45 }
 0x40f   : > { %v2343_v50 = vpop.f32.mrf.mxu1  ;;  %v2427_v52 = vpop.f32.mrf.mxu0 }
 0x410   : > { %v2348_v53 = vadd.f32 %v2343_v50, %v2256_v47 }
 0x411   : > { %v2345_v2 = vpop.f32.mrf.mxu1  ;;  %v2429_v56 = vpop.f32.mrf.mxu0 }
 0x412   : > { %v2349_v54 = vadd.f32 %v2345_v2, %v2257_v49  ;;  %v2432_v55 = vadd.f32 %v2427_v52, %v2348_v53 }
 0x413   : > { %v2519_v24 = vpop.f32.mrf.mxu1 }
 0x414   : > { %v2433_v25 = vadd.f32 %v2429_v56, %v2349_v54  ;;  %v2524_v57 = vadd.f32 %v2519_v24, %v2432_v55 }
 0x415   : > { %v2521_v59 = vpop.f32.mrf.mxu1 }
 0x416   : > { %v2525_v61 = vadd.f32 %v2521_v59, %v2433_v25 }
 0x417   : > { %v2611_v60 = vpop.f32.mrf.mxu0 }
 0x418   : > { %v2616_v13 = vadd.f32 %v2611_v60, %v2524_v57 }
 0x419   : > { %v2613_v14 = vpop.f32.mrf.mxu0 }
 0x41a   : > { %v2617_v4 = vadd.f32 %v2613_v14, %v2525_v61 }
 0x41b   : > { %v2703_v63 = vpop.f32.mrf.mxu1 }
 0x41c   : > { %v2708_v5 = vadd.f32 %v2703_v63, %v2616_v13 }
 0x41d   : > { %v2705_v3 = vpop.f32.mrf.mxu1 }
 0x41e   : > { %v2709_v27 = vadd.f32 %v2705_v3, %v2617_v4 }
 0x41f   : > { %v2795_v6 = vpop.f32.mrf.mxu0  ;;  %v2885_v19 = vpop.f32.mrf.mxu1 }
 0x420   : > { %v2800_v28 = vadd.f32 %v2795_v6, %v2708_v5 }
 0x421   : > { %v2797_v12 = vpop.f32.mrf.mxu0  ;;  %v2887_v21 = vpop.f32.mrf.mxu1 }
 0x422   : > { %v2801_v15 = vadd.f32 %v2797_v12, %v2709_v27  ;;  %v2809_v31 = vadd.f32 %v2807_v7, %v2800_v28 }
 0x424   : > { %v2810_v39 = vadd.f32 %v2807_v7, %v2801_v15  ;;  %v2811_v17 = vmax.f32 %v2809_v31, 0.0 }
 0x426   : > { %v2812_v9 = vmax.f32 %v2810_v39, 0.0 }
 0x428   : > { %3162 = vmatprep.subr.msk.mxu0 %vm351_vm1, %v2812_v9 }
 0x429   : > { %3163 = vmatpush1.msk.msra.mxu0 %vm351_vm1, %v2811_v17 }
 0x42a   : > { %3164 = vmatmul.mubr.msk.f32.vlgmr.msra.gmra.mxu0 %vm347_vm5, %v2813_v18 }
 0x4ea   : > { %v2965_v10 = vpop.f32.mrf.mxu0 }
 0x4eb   : > { %v2966_v20 = vadd.f32 %v2965_v10, %v2885_v19 }
 0x4ec   : > { %v2967_v44 = vpop.f32.mrf.mxu0 }
 0x4ed   : > { %v2968_v51 = vadd.f32 %v2967_v44, %v2887_v21  ;;  %v2976_v29 = vadd.f32 %v2974_v26, %v2966_v20 }
 0x4ef   : > { %v2977_v30 = vadd.f32 %v2974_v26, %v2968_v51 }
 0x4f1   : > { %v2980_v32 = vcombine.low %v2976_v29, %v2977_v30 }
 0x4f3   : > { %2982 = vst [vmem:[%s251_s10] sm:$0xff] %v2980_v32 }
 0x4f4 PF: > { %s16_s21 = sadd.s32 1, %s3196_s21  }
 0x4f5   : > { %p13_p4 = scmp.ge.s32.totalorder %s16_s21, 4  }
 0x4f7   :  { %15 = sbr.rel (!%p13_p4) target bundleno = 1 (0x1), region = 103 }

</bundles_post_ra>
